<compile_context>
chip_gen: v6e
topology: v6e:2x2x1
jax: 0.10.0
libtpu: 0.0.40
codegen_flags: <defaults>
</compile_context>

<pallas_src>
import functools
import math

import jax
import jax.numpy as jnp
import numpy as np
from jax.experimental import pallas as pl
from jax.experimental.pallas import tpu as pltpu


# ------------------------------- helpers ------------------------------------

def _layer_norm(x, g, b, eps):
    mu = jnp.mean(x, axis=-1, keepdims=True)
    xc = x - mu
    var = jnp.mean(xc * xc, axis=-1, keepdims=True)
    return xc * jax.lax.rsqrt(var + eps) * g + b


# ------------------------------- kernel -------------------------------------

def _encoder_layer_kernel(
    x_ref,                                   # (1, S, E)    f32   this batch element
    qw_ref, kw_ref, vw_ref,                  # (1, H, E, Dh) bf16  per-layer
    qb_ref, kb_ref, vb_ref,                  # (1, H, 1, Dh) f32
    ow_ref, ob_ref,                          # (1, H, Dh, E) bf16 ; (1, 1, E) f32
    ln1g_ref, ln1b_ref,                      # (1, 1, E) f32
    w1_ref, b1_ref,                          # (1, E, F) bf16 ; (1, 1, F) f32
    w2_ref, b2_ref,                          # (1, F, E) bf16 ; (1, 1, E) f32
    ln2g_ref, ln2b_ref,                      # (1, 1, E) f32
    fcw_ref, fcb_ref,                        # (E, O) f32 ; (1, O) f32 (resident)
    y_ref,                                   # (1, S, O)    f32   per-batch fc output
    x_state,                                 # VMEM (S, E)  f32   carried across layers
    *, num_heads, eps):
    l = pl.program_id(1)

    # Load this batch element's activations once, at the first layer.
    @pl.when(l == 0)
    def _():
        x_state[...] = x_ref[0]

    x = x_state[...]                         # (S, E) f32
    S, E = x.shape
    H = num_heads
    Dh = E // H
    scale = 1.0 / math.sqrt(Dh)
    bf16 = jnp.bfloat16

    # ----------------- multi-head self-attention (head axis batched) --------
    xh = jnp.broadcast_to(x.astype(bf16)[None], (H, S, E))            # (H, S, E)
    q = jnp.einsum('hse,hed->hsd', xh, qw_ref[0],
                   preferred_element_type=jnp.float32) + qb_ref[0]    # (H, S, Dh)
    k = jnp.einsum('hse,hed->hsd', xh, kw_ref[0],
                   preferred_element_type=jnp.float32) + kb_ref[0]
    v = jnp.einsum('hse,hed->hsd', xh, vw_ref[0],
                   preferred_element_type=jnp.float32) + vb_ref[0]

    s = jnp.einsum('hqd,hkd->hqk', q.astype(bf16), k.astype(bf16),
                   preferred_element_type=jnp.float32) * scale        # (H, S, S) f32
    m = jnp.max(s, axis=-1, keepdims=True)
    e = jnp.exp(s - m)
    p = e * pl.reciprocal(jnp.sum(e, axis=-1, keepdims=True), approx=True)

    o = jnp.einsum('hqk,hkd->hqd', p.astype(bf16), v.astype(bf16),
                   preferred_element_type=jnp.float32)                # (H, S, Dh)
    proj = jnp.einsum('hqd,hde->hqe', o.astype(bf16), ow_ref[0],
                      preferred_element_type=jnp.float32)             # (H, S, E)
    attn = jnp.sum(proj, axis=0) + ob_ref[0]                          # (S, E)

    x = _layer_norm(x + attn, ln1g_ref[0], ln1b_ref[0], eps)

    # ----------------- feed-forward (bf16 operands, f32 accumulation) -------
    h1 = jnp.dot(x.astype(bf16), w1_ref[0],
                 preferred_element_type=jnp.float32) + b1_ref[0]
    h1 = jnp.maximum(h1, 0.0)
    h2 = jnp.dot(h1.astype(bf16), w2_ref[0],
                 preferred_element_type=jnp.float32) + b2_ref[0]
    x = _layer_norm(x + h2, ln2g_ref[0], ln2b_ref[0], eps)

    x_state[...] = x

    # After the last layer, apply the final fc for this batch element.  fc is
    # affine, so mean_over_batch(fc(x)) == fc(mean_over_batch(x)); the tiny
    # (N, S, O) mean is done by the wrapper outside the kernel.
    @pl.when(l == pl.num_programs(1) - 1)
    def _():
        y = jnp.dot(x, fcw_ref[...], preferred_element_type=jnp.float32) + fcb_ref[...]
        y_ref[0] = y.astype(y_ref.dtype)


# ------------------------------- wrapper ------------------------------------

def transformer_model(x, params, num_heads):
    """x: (S, N, E) -> (S, output_dim), matching the PyTorch module (eval mode)."""
    S, N, E = x.shape
    H = num_heads
    assert E % H == 0
    Dh = E // H
    L = params["lin1_w"].shape[0]
    F = params["lin1_w"].shape[2]
    O = params["fc_w"].shape[1]

    xb = jnp.transpose(x, (1, 0, 2)).astype(jnp.float32)      # (N, S, E) batch-major

    kern = functools.partial(_encoder_layer_kernel, num_heads=H, eps=1e-5)

    # Per-layer weights: block = one layer, streamed along the "arbitrary" layer axis.
    layer4 = lambda shp: pl.BlockSpec((1,) + shp, lambda n, l: (l, 0, 0, 0))
    layer3 = lambda shp: pl.BlockSpec((1,) + shp, lambda n, l: (l, 0, 0))

    grid_spec = pltpu.PrefetchScalarGridSpec(
        num_scalar_prefetch=0,
        grid=(N, L),
        in_specs=[
            pl.BlockSpec((1, S, E), lambda n, l: (n, 0, 0)),           # x (per batch)
            layer4((H, E, Dh)), layer4((H, E, Dh)), layer4((H, E, Dh)),  # q/k/v w
            layer4((H, 1, Dh)), layer4((H, 1, Dh)), layer4((H, 1, Dh)),  # q/k/v b
            layer4((H, Dh, E)),                                        # out_proj w
            layer3((1, E)),                                            # out_proj b
            layer3((1, E)), layer3((1, E)),                            # ln1 g/b
            layer3((E, F)), layer3((1, F)),                            # lin1 w/b
            layer3((F, E)), layer3((1, E)),                            # lin2 w/b
            layer3((1, E)), layer3((1, E)),                            # ln2 g/b
            pl.BlockSpec((E, O), lambda n, l: (0, 0)),                 # fc_w (resident)
            pl.BlockSpec((1, O), lambda n, l: (0, 0)),                 # fc_b (resident)
        ],
        out_specs=pl.BlockSpec((1, S, O), lambda n, l: (n, 0, 0)),
        scratch_shapes=[pltpu.VMEM((S, E), jnp.float32)],
    )

    y_per_batch = pl.pallas_call(
        kern,
        out_shape=jax.ShapeDtypeStruct((N, S, O), jnp.float32),
        grid_spec=grid_spec,
        compiler_params=pltpu.CompilerParams(
            dimension_semantics=("parallel", "arbitrary")),
    )(xb,
      params["q_w"], params["k_w"], params["v_w"],
      params["q_b"], params["k_b"], params["v_b"],
      params["out_w"], params["out_b"],
      params["ln1_g"], params["ln1_b"],
      params["lin1_w"], params["lin1_b"],
      params["lin2_w"], params["lin2_b"],
      params["ln2_g"], params["ln2_b"],
      params["fc_w"], params["fc_b"])

    # x.mean(dim=1): tiny (N, S, O) reduction outside the kernel (fc already applied).
    return jnp.mean(y_per_batch, axis=0).astype(x.dtype)


# --------------------------- parameters (kernel layout) ---------------------
# Note on PyTorch state_dict mapping: in_proj_weight is (3E, E); the per-head
# layouts below correspond to q_w[l, h] = Wq[h*Dh:(h+1)*Dh, :].T (shape (E, Dh)),
# out_w[l, h] = out_proj.weight.T[h*Dh:(h+1)*Dh, :] (shape (Dh, E)), linear
# weights transposed to (in, out), biases reshaped to 2-D/3-D as shown.

def init_params(key, hidden_dim, output_dim, dim_feedforward, num_layers, num_heads):
    E, F, L, H = hidden_dim, dim_feedforward, num_layers, num_heads
    Dh = E // H
    bf = jnp.bfloat16

    def uniform(k, shape, fan_in, dtype=jnp.float32):
        bound = 1.0 / math.sqrt(fan_in)
        return jax.random.uniform(k, shape, jnp.float32, -bound, bound).astype(dtype)

    keys = jax.random.split(key, 14)
    return {
        "q_w":   uniform(keys[0], (L, H, E, Dh), E, bf),
        "k_w":   uniform(keys[1], (L, H, E, Dh), E, bf),
        "v_w":   uniform(keys[2], (L, H, E, Dh), E, bf),
        "q_b":   uniform(keys[3], (L, H, 1, Dh), E),
        "k_b":   uniform(keys[4], (L, H, 1, Dh), E),
        "v_b":   uniform(keys[5], (L, H, 1, Dh), E),
        "out_w": uniform(keys[6], (L, H, Dh, E), E, bf),
        "out_b": uniform(keys[7], (L, 1, E), E),
        "ln1_g": jnp.ones((L, 1, E), jnp.float32),
        "ln1_b": jnp.zeros((L, 1, E), jnp.float32),
        "lin1_w": uniform(keys[8], (L, E, F), E, bf),
        "lin1_b": uniform(keys[9], (L, 1, F), E),
        "lin2_w": uniform(keys[10], (L, F, E), F, bf),
        "lin2_b": uniform(keys[11], (L, 1, E), F),
        "ln2_g": jnp.ones((L, 1, E), jnp.float32),
        "ln2_b": jnp.zeros((L, 1, E), jnp.float32),
        "fc_w": uniform(keys[12], (E, output_dim), E),
        "fc_b": uniform(keys[13], (1, output_dim), E),
    }


# --------------------------- pure-JAX reference -----------------------------

def reference_forward(x, params, num_heads, eps=1e-5):
    """XLA reference mirroring the kernel's math (bf16 dot operands, f32 elsewhere)."""
    S, N, E = x.shape
    H = num_heads
    Dh = E // H
    L = params["lin1_w"].shape[0]
    bf = jnp.bfloat16
    scale = 1.0 / math.sqrt(Dh)

    xs = jnp.transpose(x, (1, 0, 2)).astype(jnp.float32)      # (N, S, E)
    outs = []
    for n in range(N):
        h = xs[n]
        for l in range(L):
            xh = jnp.broadcast_to(h.astype(bf)[None], (H, S, E))
            q = jnp.einsum('hse,hed->hsd', xh, params["q_w"][l],
                           preferred_element_type=jnp.float32) + params["q_b"][l]
            k = jnp.einsum('hse,hed->hsd', xh, params["k_w"][l],
                           preferred_element_type=jnp.float32) + params["k_b"][l]
            v = jnp.einsum('hse,hed->hsd', xh, params["v_w"][l],
                           preferred_element_type=jnp.float32) + params["v_b"][l]
            s = jnp.einsum('hqd,hkd->hqk', q.astype(bf), k.astype(bf),
                           preferred_element_type=jnp.float32) * scale
            p = jax.nn.softmax(s, axis=-1)
            o = jnp.einsum('hqk,hkd->hqd', p.astype(bf), v.astype(bf),
                           preferred_element_type=jnp.float32)
            proj = jnp.einsum('hqd,hde->hqe', o.astype(bf), params["out_w"][l],
                              preferred_element_type=jnp.float32)
            attn = jnp.sum(proj, axis=0) + params["out_b"][l]
            h = _layer_norm(h + attn, params["ln1_g"][l], params["ln1_b"][l], eps)
            f1 = jnp.maximum(jnp.dot(h.astype(bf), params["lin1_w"][l],
                                     preferred_element_type=jnp.float32)
                             + params["lin1_b"][l], 0.0)
            f2 = jnp.dot(f1.astype(bf), params["lin2_w"][l],
                         preferred_element_type=jnp.float32) + params["lin2_b"][l]
            h = _layer_norm(h + f2, params["ln2_g"][l], params["ln2_b"][l], eps)
        outs.append(h)
    xm = jnp.mean(jnp.stack(outs, axis=0), axis=0)            # (S, E)
    return jnp.dot(xm, params["fc_w"],
                   preferred_element_type=jnp.float32) + params["fc_b"]


# --------------------------------- driver -----------------------------------

if __name__ == "__main__":
    SEQ, BATCH = 8, 2
    HIDDEN, OUTPUT = 32, 16
    NUM_HEADS = 8          # PyTorch default of this module
    NUM_LAYERS = 2         # constructor default is 6; kept small for the demo
    DIM_FF = 2048          # nn.TransformerEncoderLayer default

    key = jax.random.PRNGKey(0)
    k_x, k_p = jax.random.split(key)
    x = jax.random.normal(k_x, (SEQ, BATCH, HIDDEN), jnp.float32)
    params = init_params(k_p, HIDDEN, OUTPUT, DIM_FF, NUM_LAYERS, NUM_HEADS)

    fwd = jax.jit(functools.partial(transformer_model, num_heads=NUM_HEADS))
    y = fwd(x, params)
    jax.block_until_ready(y)

    assert y.shape == (SEQ, OUTPUT), y.shape
    assert y.dtype == jnp.float32
    assert bool(jnp.all(jnp.isfinite(y)))

    y_ref = reference_forward(x, params, NUM_HEADS)
    np.testing.assert_allclose(np.asarray(y), np.asarray(y_ref), rtol=2e-2, atol=2e-2)

    print("KERNEL_OK")
</pallas_src>

<mosaic_0001>
module attributes {stable_mosaic.version = 11 : i64} {
  func.func @_encoder_layer_kernel(%arg0: i32, %arg1: i32, %arg2: memref<1x8x32xf32, #tpu.memory_space<vmem>>, %arg3: memref<1x8x32x4xbf16, #tpu.memory_space<vmem>>, %arg4: memref<1x8x32x4xbf16, #tpu.memory_space<vmem>>, %arg5: memref<1x8x32x4xbf16, #tpu.memory_space<vmem>>, %arg6: memref<1x8x1x4xf32, #tpu.memory_space<vmem>>, %arg7: memref<1x8x1x4xf32, #tpu.memory_space<vmem>>, %arg8: memref<1x8x1x4xf32, #tpu.memory_space<vmem>>, %arg9: memref<1x8x4x32xbf16, #tpu.memory_space<vmem>>, %arg10: memref<1x1x32xf32, #tpu.memory_space<vmem>>, %arg11: memref<1x1x32xf32, #tpu.memory_space<vmem>>, %arg12: memref<1x1x32xf32, #tpu.memory_space<vmem>>, %arg13: memref<1x32x2048xbf16, #tpu.memory_space<vmem>>, %arg14: memref<1x1x2048xf32, #tpu.memory_space<vmem>>, %arg15: memref<1x2048x32xbf16, #tpu.memory_space<vmem>>, %arg16: memref<1x1x32xf32, #tpu.memory_space<vmem>>, %arg17: memref<1x1x32xf32, #tpu.memory_space<vmem>>, %arg18: memref<1x1x32xf32, #tpu.memory_space<vmem>>, %arg19: memref<32x16xf32, #tpu.memory_space<vmem>>, %arg20: memref<1x16xf32, #tpu.memory_space<vmem>>, %arg21: memref<1x8x16xf32, #tpu.memory_space<vmem>>, %arg22: memref<8x32xf32, #tpu.memory_space<vmem>>) attributes {dimension_semantics = [#tpu.dimension_semantics<parallel>, #tpu.dimension_semantics<arbitrary>], iteration_bounds = array<i64: 2, 2>, scalar_prefetch = 0 : i64, scratch_operands = 1 : i64, tpu.core_type = #tpu.core_type<tc>, window_params = [{transform_indices = @transform_0, window_bounds = array<i64: 1, 8, 32>}, {transform_indices = @transform_1, window_bounds = array<i64: 1, 8, 32, 4>}, {transform_indices = @transform_2, window_bounds = array<i64: 1, 8, 32, 4>}, {transform_indices = @transform_3, window_bounds = array<i64: 1, 8, 32, 4>}, {transform_indices = @transform_4, window_bounds = array<i64: 1, 8, 1, 4>}, {transform_indices = @transform_5, window_bounds = array<i64: 1, 8, 1, 4>}, {transform_indices = @transform_6, window_bounds = array<i64: 1, 8, 1, 4>}, {transform_indices = @transform_7, window_bounds = array<i64: 1, 8, 4, 32>}, {transform_indices = @transform_8, window_bounds = array<i64: 1, 1, 32>}, {transform_indices = @transform_9, window_bounds = array<i64: 1, 1, 32>}, {transform_indices = @transform_10, window_bounds = array<i64: 1, 1, 32>}, {transform_indices = @transform_11, window_bounds = array<i64: 1, 32, 2048>}, {transform_indices = @transform_12, window_bounds = array<i64: 1, 1, 2048>}, {transform_indices = @transform_13, window_bounds = array<i64: 1, 2048, 32>}, {transform_indices = @transform_14, window_bounds = array<i64: 1, 1, 32>}, {transform_indices = @transform_15, window_bounds = array<i64: 1, 1, 32>}, {transform_indices = @transform_16, window_bounds = array<i64: 1, 1, 32>}, {pipeline_mode = #tpu.pipeline_mode<synchronous>, transform_indices = @transform_17, window_bounds = array<i64: 32, 16>}, {pipeline_mode = #tpu.pipeline_mode<synchronous>, transform_indices = @transform_18, window_bounds = array<i64: 1, 16>}, {transform_indices = @transform_19, window_bounds = array<i64: 1, 8, 16>}]} {
    %c0_i32 = arith.constant 0 : i32
    %0 = arith.cmpi eq, %arg1, %c0_i32 : i32
    %1 = arith.extui %0 : i1 to i32
    %c0_i32_0 = arith.constant 0 : i32
    %2 = arith.cmpi ne, %1, %c0_i32_0 : i32
    scf.if %2 {
      %c0_82 = arith.constant 0 : index
      %c0_83 = arith.constant 0 : index
      %c0_84 = arith.constant 0 : index
      %128 = vector.load %arg2[%c0_82, %c0_83, %c0_84] : memref<1x8x32xf32, #tpu.memory_space<vmem>>, vector<1x8x32xf32>
      %129 = vector.shape_cast %128 : vector<1x8x32xf32> to vector<8x32xf32>
      %c0_85 = arith.constant 0 : index
      %c0_86 = arith.constant 0 : index
      %130 = vector.load %arg22[%c0_85, %c0_86] : memref<8x32xf32, #tpu.memory_space<vmem>>, vector<8x32xf32>
      tpu.vector_store %arg22[%c0_85, %c0_86], %129 {strides = array<i32>} : memref<8x32xf32, #tpu.memory_space<vmem>>, vector<8x32xf32>,
    } else {
    }
    %c0 = arith.constant 0 : index
    %c0_1 = arith.constant 0 : index
    %3 = vector.load %arg22[%c0, %c0_1] : memref<8x32xf32, #tpu.memory_space<vmem>>, vector<8x32xf32>
    %4 = arith.truncf %3 : vector<8x32xf32> to vector<8x32xbf16>
    %5 = vector.shape_cast %4 : vector<8x32xbf16> to vector<1x8x32xbf16>
    %6 = vector.shape_cast %5 : vector<1x8x32xbf16> to vector<1x8x32xbf16>
    %7 = vector.broadcast %6 : vector<1x8x32xbf16> to vector<8x8x32xbf16>
    %c0_2 = arith.constant 0 : index
    %c0_3 = arith.constant 0 : index
    %c0_4 = arith.constant 0 : index
    %c0_5 = arith.constant 0 : index
    %8 = vector.load %arg3[%c0_2, %c0_3, %c0_4, %c0_5] : memref<1x8x32x4xbf16, #tpu.memory_space<vmem>>, vector<1x8x32x4xbf16>
    %9 = vector.shape_cast %8 : vector<1x8x32x4xbf16> to vector<8x32x4xbf16>
    "tpu.trace_start"() <{level = 10 : i32, message = "hse,hed->hsd"}> : () -> ()
    %cst = arith.constant dense<0.000000e+00> : vector<8x8x4xf32>
    %10 = tpu.matmul %7, %9, %cst {dimension_numbers = #tpu.dot_dimension_numbers<[2], [1], [1], [2], [0, 0, 0, 1, 1, 2], [0], [0]>} : vector<8x8x32xbf16>, vector<8x32x4xbf16>, vector<8x8x4xf32> -> vector<8x8x4xf32>
    "tpu.trace_stop"() : () -> ()
    %c0_6 = arith.constant 0 : index
    %c0_7 = arith.constant 0 : index
    %c0_8 = arith.constant 0 : index
    %c0_9 = arith.constant 0 : index
    %11 = vector.load %arg6[%c0_6, %c0_7, %c0_8, %c0_9] : memref<1x8x1x4xf32, #tpu.memory_space<vmem>>, vector<1x8x1x4xf32>
    %12 = vector.shape_cast %11 : vector<1x8x1x4xf32> to vector<8x1x4xf32>
    %13 = vector.broadcast %12 : vector<8x1x4xf32> to vector<8x8x4xf32>
    %14 = arith.addf %10, %13 : vector<8x8x4xf32>
    %c0_10 = arith.constant 0 : index
    %c0_11 = arith.constant 0 : index
    %c0_12 = arith.constant 0 : index
    %c0_13 = arith.constant 0 : index
    %15 = vector.load %arg4[%c0_10, %c0_11, %c0_12, %c0_13] : memref<1x8x32x4xbf16, #tpu.memory_space<vmem>>, vector<1x8x32x4xbf16>
    %16 = vector.shape_cast %15 : vector<1x8x32x4xbf16> to vector<8x32x4xbf16>
    "tpu.trace_start"() <{level = 10 : i32, message = "hse,hed->hsd"}> : () -> ()
    %cst_14 = arith.constant dense<0.000000e+00> : vector<8x8x4xf32>
    %17 = tpu.matmul %7, %16, %cst_14 {dimension_numbers = #tpu.dot_dimension_numbers<[2], [1], [1], [2], [0, 0, 0, 1, 1, 2], [0], [0]>} : vector<8x8x32xbf16>, vector<8x32x4xbf16>, vector<8x8x4xf32> -> vector<8x8x4xf32>
    "tpu.trace_stop"() : () -> ()
    %c0_15 = arith.constant 0 : index
    %c0_16 = arith.constant 0 : index
    %c0_17 = arith.constant 0 : index
    %c0_18 = arith.constant 0 : index
    %18 = vector.load %arg7[%c0_15, %c0_16, %c0_17, %c0_18] : memref<1x8x1x4xf32, #tpu.memory_space<vmem>>, vector<1x8x1x4xf32>
    %19 = vector.shape_cast %18 : vector<1x8x1x4xf32> to vector<8x1x4xf32>
    %20 = vector.broadcast %19 : vector<8x1x4xf32> to vector<8x8x4xf32>
    %21 = arith.addf %17, %20 : vector<8x8x4xf32>
    %c0_19 = arith.constant 0 : index
    %c0_20 = arith.constant 0 : index
    %c0_21 = arith.constant 0 : index
    %c0_22 = arith.constant 0 : index
    %22 = vector.load %arg5[%c0_19, %c0_20, %c0_21, %c0_22] : memref<1x8x32x4xbf16, #tpu.memory_space<vmem>>, vector<1x8x32x4xbf16>
    %23 = vector.shape_cast %22 : vector<1x8x32x4xbf16> to vector<8x32x4xbf16>
    "tpu.trace_start"() <{level = 10 : i32, message = "hse,hed->hsd"}> : () -> ()
    %cst_23 = arith.constant dense<0.000000e+00> : vector<8x8x4xf32>
    %24 = tpu.matmul %7, %23, %cst_23 {dimension_numbers = #tpu.dot_dimension_numbers<[2], [1], [1], [2], [0, 0, 0, 1, 1, 2], [0], [0]>} : vector<8x8x32xbf16>, vector<8x32x4xbf16>, vector<8x8x4xf32> -> vector<8x8x4xf32>
    "tpu.trace_stop"() : () -> ()
    %c0_24 = arith.constant 0 : index
    %c0_25 = arith.constant 0 : index
    %c0_26 = arith.constant 0 : index
    %c0_27 = arith.constant 0 : index
    %25 = vector.load %arg8[%c0_24, %c0_25, %c0_26, %c0_27] : memref<1x8x1x4xf32, #tpu.memory_space<vmem>>, vector<1x8x1x4xf32>
    %26 = vector.shape_cast %25 : vector<1x8x1x4xf32> to vector<8x1x4xf32>
    %27 = vector.broadcast %26 : vector<8x1x4xf32> to vector<8x8x4xf32>
    %28 = arith.addf %24, %27 : vector<8x8x4xf32>
    %29 = arith.truncf %14 : vector<8x8x4xf32> to vector<8x8x4xbf16>
    %30 = arith.truncf %21 : vector<8x8x4xf32> to vector<8x8x4xbf16>
    "tpu.trace_start"() <{level = 10 : i32, message = "hqd,hkd->hqk"}> : () -> ()
    %cst_28 = arith.constant dense<0.000000e+00> : vector<8x8x8xf32>
    %31 = tpu.matmul %29, %30, %cst_28 {dimension_numbers = #tpu.dot_dimension_numbers<[2], [2], [1], [1], [0, 0, 0, 1, 1, 1], [0], [0]>} : vector<8x8x4xbf16>, vector<8x8x4xbf16>, vector<8x8x8xf32> -> vector<8x8x8xf32>
    "tpu.trace_stop"() : () -> ()
    %cst_29 = arith.constant 5.000000e-01 : f32
    %32 = vector.broadcast %cst_29 : f32 to vector<8x8x8xf32>
    %33 = arith.mulf %31, %32 : vector<8x8x8xf32>
    %cst_30 = arith.constant dense<0xFF800000> : vector<8x8xf32>
    %34 = vector.multi_reduction <maximumf>, %33, %cst_30 [2] : vector<8x8x8xf32> to vector<8x8xf32>
    %35 = vector.shape_cast %34 : vector<8x8xf32> to vector<8x8x1xf32>
    %36 = vector.broadcast %35 : vector<8x8x1xf32> to vector<8x8x8xf32>
    %37 = arith.subf %33, %36 : vector<8x8x8xf32>
    %38 = math.exp %37 : vector<8x8x8xf32>
    %cst_31 = arith.constant dense<0.000000e+00> : vector<8x8xf32>
    %39 = vector.multi_reduction <add>, %38, %cst_31 [2] : vector<8x8x8xf32> to vector<8x8xf32>
    %40 = vector.shape_cast %39 : vector<8x8xf32> to vector<8x8x1xf32>
    %41 = tpu.reciprocal %40 {approx = true} : vector<8x8x1xf32> -> vector<8x8x1xf32>
    %42 = vector.broadcast %41 : vector<8x8x1xf32> to vector<8x8x8xf32>
    %43 = arith.mulf %38, %42 : vector<8x8x8xf32>
    %44 = arith.truncf %43 : vector<8x8x8xf32> to vector<8x8x8xbf16>
    %45 = arith.truncf %28 : vector<8x8x4xf32> to vector<8x8x4xbf16>
    "tpu.trace_start"() <{level = 10 : i32, message = "hqk,hkd->hqd"}> : () -> ()
    %cst_32 = arith.constant dense<0.000000e+00> : vector<8x8x4xf32>
    %46 = tpu.matmul %44, %45, %cst_32 {dimension_numbers = #tpu.dot_dimension_numbers<[2], [1], [1], [2], [0, 0, 0, 1, 1, 2], [0], [0]>} : vector<8x8x8xbf16>, vector<8x8x4xbf16>, vector<8x8x4xf32> -> vector<8x8x4xf32>
    "tpu.trace_stop"() : () -> ()
    %47 = arith.truncf %46 : vector<8x8x4xf32> to vector<8x8x4xbf16>
    %c0_33 = arith.constant 0 : index
    %c0_34 = arith.constant 0 : index
    %c0_35 = arith.constant 0 : index
    %c0_36 = arith.constant 0 : index
    %48 = vector.load %arg9[%c0_33, %c0_34, %c0_35, %c0_36] : memref<1x8x4x32xbf16, #tpu.memory_space<vmem>>, vector<1x8x4x32xbf16>
    %49 = vector.shape_cast %48 : vector<1x8x4x32xbf16> to vector<8x4x32xbf16>
    "tpu.trace_start"() <{level = 10 : i32, message = "hqd,hde->hqe"}> : () -> ()
    %cst_37 = arith.constant dense<0.000000e+00> : vector<8x8x32xf32>
    %50 = tpu.matmul %47, %49, %cst_37 {dimension_numbers = #tpu.dot_dimension_numbers<[2], [1], [1], [2], [0, 0, 0, 1, 1, 2], [0], [0]>} : vector<8x8x4xbf16>, vector<8x4x32xbf16>, vector<8x8x32xf32> -> vector<8x8x32xf32>
    "tpu.trace_stop"() : () -> ()
    %cst_38 = arith.constant dense<0.000000e+00> : vector<8x32xf32>
    %51 = vector.multi_reduction <add>, %50, %cst_38 [0] : vector<8x8x32xf32> to vector<8x32xf32>
    %c0_39 = arith.constant 0 : index
    %c0_40 = arith.constant 0 : index
    %c0_41 = arith.constant 0 : index
    %52 = vector.load %arg10[%c0_39, %c0_40, %c0_41] : memref<1x1x32xf32, #tpu.memory_space<vmem>>, vector<1x1x32xf32>
    %53 = vector.shape_cast %52 : vector<1x1x32xf32> to vector<1x32xf32>
    %54 = vector.broadcast %53 : vector<1x32xf32> to vector<8x32xf32>
    %55 = arith.addf %51, %54 : vector<8x32xf32>
    %56 = arith.addf %3, %55 : vector<8x32xf32>
    %c0_42 = arith.constant 0 : index
    %c0_43 = arith.constant 0 : index
    %c0_44 = arith.constant 0 : index
    %57 = vector.load %arg11[%c0_42, %c0_43, %c0_44] : memref<1x1x32xf32, #tpu.memory_space<vmem>>, vector<1x1x32xf32>
    %58 = vector.shape_cast %57 : vector<1x1x32xf32> to vector<1x32xf32>
    %c0_45 = arith.constant 0 : index
    %c0_46 = arith.constant 0 : index
    %c0_47 = arith.constant 0 : index
    %59 = vector.load %arg12[%c0_45, %c0_46, %c0_47] : memref<1x1x32xf32, #tpu.memory_space<vmem>>, vector<1x1x32xf32>
    %60 = vector.shape_cast %59 : vector<1x1x32xf32> to vector<1x32xf32>
    %cst_48 = arith.constant dense<0.000000e+00> : vector<8xf32>
    %61 = vector.multi_reduction <add>, %56, %cst_48 [1] : vector<8x32xf32> to vector<8xf32>
    %62 = vector.shape_cast %61 : vector<8xf32> to vector<8x1xf32>
    %cst_49 = arith.constant 3.200000e+01 : f32
    %63 = vector.broadcast %cst_49 : f32 to vector<8x1xf32>
    %64 = arith.divf %62, %63 : vector<8x1xf32>
    %65 = vector.broadcast %64 : vector<8x1xf32> to vector<8x32xf32>
    %66 = arith.subf %56, %65 : vector<8x32xf32>
    %67 = arith.mulf %66, %66 : vector<8x32xf32>
    %cst_50 = arith.constant dense<0.000000e+00> : vector<8xf32>
    %68 = vector.multi_reduction <add>, %67, %cst_50 [1] : vector<8x32xf32> to vector<8xf32>
    %69 = vector.shape_cast %68 : vector<8xf32> to vector<8x1xf32>
    %cst_51 = arith.constant 3.200000e+01 : f32
    %70 = vector.broadcast %cst_51 : f32 to vector<8x1xf32>
    %71 = arith.divf %69, %70 : vector<8x1xf32>
    %cst_52 = arith.constant 9.99999974E-6 : f32
    %72 = vector.broadcast %cst_52 : f32 to vector<8x1xf32>
    %73 = arith.addf %71, %72 : vector<8x1xf32>
    %74 = math.rsqrt %73 : vector<8x1xf32>
    %75 = vector.broadcast %74 : vector<8x1xf32> to vector<8x32xf32>
    %76 = arith.mulf %66, %75 : vector<8x32xf32>
    %77 = vector.broadcast %58 : vector<1x32xf32> to vector<8x32xf32>
    %78 = arith.mulf %76, %77 : vector<8x32xf32>
    %79 = vector.broadcast %60 : vector<1x32xf32> to vector<8x32xf32>
    %80 = arith.addf %78, %79 : vector<8x32xf32>
    %81 = arith.truncf %80 : vector<8x32xf32> to vector<8x32xbf16>
    %c0_53 = arith.constant 0 : index
    %c0_54 = arith.constant 0 : index
    %c0_55 = arith.constant 0 : index
    %82 = vector.load %arg13[%c0_53, %c0_54, %c0_55] : memref<1x32x2048xbf16, #tpu.memory_space<vmem>>, vector<1x32x2048xbf16>
    %83 = vector.shape_cast %82 : vector<1x32x2048xbf16> to vector<32x2048xbf16>
    %cst_56 = arith.constant dense<0.000000e+00> : vector<8x2048xf32>
    %84 = tpu.matmul %81, %83, %cst_56 {dimension_numbers = #tpu.dot_dimension_numbers<[1], [0], [0], [1], [0, 0, 1, 1], [], []>} : vector<8x32xbf16>, vector<32x2048xbf16>, vector<8x2048xf32> -> vector<8x2048xf32>
    %c0_57 = arith.constant 0 : index
    %c0_58 = arith.constant 0 : index
    %c0_59 = arith.constant 0 : index
    %85 = vector.load %arg14[%c0_57, %c0_58, %c0_59] : memref<1x1x2048xf32, #tpu.memory_space<vmem>>, vector<1x1x2048xf32>
    %86 = vector.shape_cast %85 : vector<1x1x2048xf32> to vector<1x2048xf32>
    %87 = vector.broadcast %86 : vector<1x2048xf32> to vector<8x2048xf32>
    %88 = arith.addf %84, %87 : vector<8x2048xf32>
    %cst_60 = arith.constant 0.000000e+00 : f32
    %89 = vector.broadcast %cst_60 : f32 to vector<8x2048xf32>
    %90 = arith.maximumf %88, %89 : vector<8x2048xf32>
    %91 = arith.truncf %90 : vector<8x2048xf32> to vector<8x2048xbf16>
    %c0_61 = arith.constant 0 : index
    %c0_62 = arith.constant 0 : index
    %c0_63 = arith.constant 0 : index
    %92 = vector.load %arg15[%c0_61, %c0_62, %c0_63] : memref<1x2048x32xbf16, #tpu.memory_space<vmem>>, vector<1x2048x32xbf16>
    %93 = vector.shape_cast %92 : vector<1x2048x32xbf16> to vector<2048x32xbf16>
    %cst_64 = arith.constant dense<0.000000e+00> : vector<8x32xf32>
    %94 = tpu.matmul %91, %93, %cst_64 {dimension_numbers = #tpu.dot_dimension_numbers<[1], [0], [0], [1], [0, 0, 1, 1], [], []>} : vector<8x2048xbf16>, vector<2048x32xbf16>, vector<8x32xf32> -> vector<8x32xf32>
    %c0_65 = arith.constant 0 : index
    %c0_66 = arith.constant 0 : index
    %c0_67 = arith.constant 0 : index
    %95 = vector.load %arg16[%c0_65, %c0_66, %c0_67] : memref<1x1x32xf32, #tpu.memory_space<vmem>>, vector<1x1x32xf32>
    %96 = vector.shape_cast %95 : vector<1x1x32xf32> to vector<1x32xf32>
    %97 = vector.broadcast %96 : vector<1x32xf32> to vector<8x32xf32>
    %98 = arith.addf %94, %97 : vector<8x32xf32>
    %99 = arith.addf %80, %98 : vector<8x32xf32>
    %c0_68 = arith.constant 0 : index
    %c0_69 = arith.constant 0 : index
    %c0_70 = arith.constant 0 : index
    %100 = vector.load %arg17[%c0_68, %c0_69, %c0_70] : memref<1x1x32xf32, #tpu.memory_space<vmem>>, vector<1x1x32xf32>
    %101 = vector.shape_cast %100 : vector<1x1x32xf32> to vector<1x32xf32>
    %c0_71 = arith.constant 0 : index
    %c0_72 = arith.constant 0 : index
    %c0_73 = arith.constant 0 : index
    %102 = vector.load %arg18[%c0_71, %c0_72, %c0_73] : memref<1x1x32xf32, #tpu.memory_space<vmem>>, vector<1x1x32xf32>
    %103 = vector.shape_cast %102 : vector<1x1x32xf32> to vector<1x32xf32>
    %cst_74 = arith.constant dense<0.000000e+00> : vector<8xf32>
    %104 = vector.multi_reduction <add>, %99, %cst_74 [1] : vector<8x32xf32> to vector<8xf32>
    %105 = vector.shape_cast %104 : vector<8xf32> to vector<8x1xf32>
    %cst_75 = arith.constant 3.200000e+01 : f32
    %106 = vector.broadcast %cst_75 : f32 to vector<8x1xf32>
    %107 = arith.divf %105, %106 : vector<8x1xf32>
    %108 = vector.broadcast %107 : vector<8x1xf32> to vector<8x32xf32>
    %109 = arith.subf %99, %108 : vector<8x32xf32>
    %110 = arith.mulf %109, %109 : vector<8x32xf32>
    %cst_76 = arith.constant dense<0.000000e+00> : vector<8xf32>
    %111 = vector.multi_reduction <add>, %110, %cst_76 [1] : vector<8x32xf32> to vector<8xf32>
    %112 = vector.shape_cast %111 : vector<8xf32> to vector<8x1xf32>
    %cst_77 = arith.constant 3.200000e+01 : f32
    %113 = vector.broadcast %cst_77 : f32 to vector<8x1xf32>
    %114 = arith.divf %112, %113 : vector<8x1xf32>
    %cst_78 = arith.constant 9.99999974E-6 : f32
    %115 = vector.broadcast %cst_78 : f32 to vector<8x1xf32>
    %116 = arith.addf %114, %115 : vector<8x1xf32>
    %117 = math.rsqrt %116 : vector<8x1xf32>
    %118 = vector.broadcast %117 : vector<8x1xf32> to vector<8x32xf32>
    %119 = arith.mulf %109, %118 : vector<8x32xf32>
    %120 = vector.broadcast %101 : vector<1x32xf32> to vector<8x32xf32>
    %121 = arith.mulf %119, %120 : vector<8x32xf32>
    %122 = vector.broadcast %103 : vector<1x32xf32> to vector<8x32xf32>
    %123 = arith.addf %121, %122 : vector<8x32xf32>
    %c0_79 = arith.constant 0 : index
    %c0_80 = arith.constant 0 : index
    %124 = vector.load %arg22[%c0_79, %c0_80] : memref<8x32xf32, #tpu.memory_space<vmem>>, vector<8x32xf32>
    tpu.vector_store %arg22[%c0_79, %c0_80], %123 {strides = array<i32>} : memref<8x32xf32, #tpu.memory_space<vmem>>, vector<8x32xf32>,
    %c1_i32 = arith.constant 1 : i32
    %125 = arith.cmpi eq, %arg1, %c1_i32 : i32
    %126 = arith.extui %125 : i1 to i32
    %c0_i32_81 = arith.constant 0 : i32
    %127 = arith.cmpi ne, %126, %c0_i32_81 : i32
    scf.if %127 {
      %c0_82 = arith.constant 0 : index
      %c0_83 = arith.constant 0 : index
      %128 = vector.load %arg19[%c0_82, %c0_83] : memref<32x16xf32, #tpu.memory_space<vmem>>, vector<32x16xf32>
      %cst_84 = arith.constant dense<0.000000e+00> : vector<8x16xf32>
      %129 = tpu.matmul %123, %128, %cst_84 {dimension_numbers = #tpu.dot_dimension_numbers<[1], [0], [0], [1], [0, 0, 1, 1], [], []>} : vector<8x32xf32>, vector<32x16xf32>, vector<8x16xf32> -> vector<8x16xf32>
      %c0_85 = arith.constant 0 : index
      %c0_86 = arith.constant 0 : index
      %130 = vector.load %arg20[%c0_85, %c0_86] : memref<1x16xf32, #tpu.memory_space<vmem>>, vector<1x16xf32>
      %131 = vector.broadcast %130 : vector<1x16xf32> to vector<8x16xf32>
      %132 = arith.addf %129, %131 : vector<8x16xf32>
      %c0_87 = arith.constant 0 : index
      %c0_88 = arith.constant 0 : index
      %c0_89 = arith.constant 0 : index
      %133 = vector.load %arg21[%c0_87, %c0_88, %c0_89] : memref<1x8x16xf32, #tpu.memory_space<vmem>>, vector<1x8x16xf32>
      %134 = vector.shape_cast %133 : vector<1x8x16xf32> to vector<8x16xf32>
      %135 = vector.shape_cast %132 : vector<8x16xf32> to vector<1x8x16xf32>
      tpu.vector_store %arg21[%c0_87, %c0_88, %c0_89], %135 {strides = array<i32>} : memref<1x8x16xf32, #tpu.memory_space<vmem>>, vector<1x8x16xf32>,
    } else {
    }
    return
  }
  func.func @transform_0(%arg0: i32, %arg1: i32) -> (i32, i32, i32) {
    %c0_i32 = arith.constant 0 : i32
    %c0_i32_0 = arith.constant 0 : i32
    %c0_i32_1 = arith.constant 0 : i32
    return %arg0, %c0_i32, %c0_i32_0 : i32, i32, i32
  }
  func.func @transform_1(%arg0: i32, %arg1: i32) -> (i32, i32, i32, i32) {
    %c0_i32 = arith.constant 0 : i32
    %c0_i32_0 = arith.constant 0 : i32
    %c0_i32_1 = arith.constant 0 : i32
    %c0_i32_2 = arith.constant 0 : i32
    return %arg1, %c0_i32, %c0_i32_0, %c0_i32_1 : i32, i32, i32, i32
  }
  func.func @transform_2(%arg0: i32, %arg1: i32) -> (i32, i32, i32, i32) {
    %c0_i32 = arith.constant 0 : i32
    %c0_i32_0 = arith.constant 0 : i32
    %c0_i32_1 = arith.constant 0 : i32
    %c0_i32_2 = arith.constant 0 : i32
    return %arg1, %c0_i32, %c0_i32_0, %c0_i32_1 : i32, i32, i32, i32
  }
  func.func @transform_3(%arg0: i32, %arg1: i32) -> (i32, i32, i32, i32) {
    %c0_i32 = arith.constant 0 : i32
    %c0_i32_0 = arith.constant 0 : i32
    %c0_i32_1 = arith.constant 0 : i32
    %c0_i32_2 = arith.constant 0 : i32
    return %arg1, %c0_i32, %c0_i32_0, %c0_i32_1 : i32, i32, i32, i32
  }
  func.func @transform_4(%arg0: i32, %arg1: i32) -> (i32, i32, i32, i32) {
    %c0_i32 = arith.constant 0 : i32
    %c0_i32_0 = arith.constant 0 : i32
    %c0_i32_1 = arith.constant 0 : i32
    %c0_i32_2 = arith.constant 0 : i32
    return %arg1, %c0_i32, %c0_i32_0, %c0_i32_1 : i32, i32, i32, i32
  }
  func.func @transform_5(%arg0: i32, %arg1: i32) -> (i32, i32, i32, i32) {
    %c0_i32 = arith.constant 0 : i32
    %c0_i32_0 = arith.constant 0 : i32
    %c0_i32_1 = arith.constant 0 : i32
    %c0_i32_2 = arith.constant 0 : i32
    return %arg1, %c0_i32, %c0_i32_0, %c0_i32_1 : i32, i32, i32, i32
  }
  func.func @transform_6(%arg0: i32, %arg1: i32) -> (i32, i32, i32, i32) {
    %c0_i32 = arith.constant 0 : i32
    %c0_i32_0 = arith.constant 0 : i32
    %c0_i32_1 = arith.constant 0 : i32
    %c0_i32_2 = arith.constant 0 : i32
    return %arg1, %c0_i32, %c0_i32_0, %c0_i32_1 : i32, i32, i32, i32
  }
  func.func @transform_7(%arg0: i32, %arg1: i32) -> (i32, i32, i32, i32) {
    %c0_i32 = arith.constant 0 : i32
    %c0_i32_0 = arith.constant 0 : i32
    %c0_i32_1 = arith.constant 0 : i32
    %c0_i32_2 = arith.constant 0 : i32
    return %arg1, %c0_i32, %c0_i32_0, %c0_i32_1 : i32, i32, i32, i32
  }
  func.func @transform_8(%arg0: i32, %arg1: i32) -> (i32, i32, i32) {
    %c0_i32 = arith.constant 0 : i32
    %c0_i32_0 = arith.constant 0 : i32
    %c0_i32_1 = arith.constant 0 : i32
    return %arg1, %c0_i32, %c0_i32_0 : i32, i32, i32
  }
  func.func @transform_9(%arg0: i32, %arg1: i32) -> (i32, i32, i32) {
    %c0_i32 = arith.constant 0 : i32
    %c0_i32_0 = arith.constant 0 : i32
    %c0_i32_1 = arith.constant 0 : i32
    return %arg1, %c0_i32, %c0_i32_0 : i32, i32, i32
  }
  func.func @transform_10(%arg0: i32, %arg1: i32) -> (i32, i32, i32) {
    %c0_i32 = arith.constant 0 : i32
    %c0_i32_0 = arith.constant 0 : i32
    %c0_i32_1 = arith.constant 0 : i32
    return %arg1, %c0_i32, %c0_i32_0 : i32, i32, i32
  }
  func.func @transform_11(%arg0: i32, %arg1: i32) -> (i32, i32, i32) {
    %c0_i32 = arith.constant 0 : i32
    %c0_i32_0 = arith.constant 0 : i32
    %c0_i32_1 = arith.constant 0 : i32
    return %arg1, %c0_i32, %c0_i32_0 : i32, i32, i32
  }
  func.func @transform_12(%arg0: i32, %arg1: i32) -> (i32, i32, i32) {
    %c0_i32 = arith.constant 0 : i32
    %c0_i32_0 = arith.constant 0 : i32
    %c0_i32_1 = arith.constant 0 : i32
    return %arg1, %c0_i32, %c0_i32_0 : i32, i32, i32
  }
  func.func @transform_13(%arg0: i32, %arg1: i32) -> (i32, i32, i32) {
    %c0_i32 = arith.constant 0 : i32
    %c0_i32_0 = arith.constant 0 : i32
    %c0_i32_1 = arith.constant 0 : i32
    return %arg1, %c0_i32, %c0_i32_0 : i32, i32, i32
  }
  func.func @transform_14(%arg0: i32, %arg1: i32) -> (i32, i32, i32) {
    %c0_i32 = arith.constant 0 : i32
    %c0_i32_0 = arith.constant 0 : i32
    %c0_i32_1 = arith.constant 0 : i32
    return %arg1, %c0_i32, %c0_i32_0 : i32, i32, i32
  }
  func.func @transform_15(%arg0: i32, %arg1: i32) -> (i32, i32, i32) {
    %c0_i32 = arith.constant 0 : i32
    %c0_i32_0 = arith.constant 0 : i32
    %c0_i32_1 = arith.constant 0 : i32
    return %arg1, %c0_i32, %c0_i32_0 : i32, i32, i32
  }
  func.func @transform_16(%arg0: i32, %arg1: i32) -> (i32, i32, i32) {
    %c0_i32 = arith.constant 0 : i32
    %c0_i32_0 = arith.constant 0 : i32
    %c0_i32_1 = arith.constant 0 : i32
    return %arg1, %c0_i32, %c0_i32_0 : i32, i32, i32
  }
  func.func @transform_17(%arg0: i32, %arg1: i32) -> (i32, i32) {
    %c0_i32 = arith.constant 0 : i32
    %c0_i32_0 = arith.constant 0 : i32
    %c0_i32_1 = arith.constant 0 : i32
    return %c0_i32, %c0_i32_0 : i32, i32
  }
  func.func @transform_18(%arg0: i32, %arg1: i32) -> (i32, i32) {
    %c0_i32 = arith.constant 0 : i32
    %c0_i32_0 = arith.constant 0 : i32
    %c0_i32_1 = arith.constant 0 : i32
    return %c0_i32, %c0_i32_0 : i32, i32
  }
  func.func @transform_19(%arg0: i32, %arg1: i32) -> (i32, i32, i32) {
    %c0_i32 = arith.constant 0 : i32
    %c0_i32_0 = arith.constant 0 : i32
    %c0_i32_1 = arith.constant 0 : i32
    return %arg0, %c0_i32, %c0_i32_0 : i32, i32, i32
  }
}

</mosaic_0001>

<bundles_post_ra>
// kernel: transformer_model.1
= control target key start
LH: loop header
LB: loop body
LE: loop exit
PB: predicated region body
PF: predicated region fallthrough
CT: control target
= control target key end

     0   :  { %s7446_s30 = smov 0   ;;  %s7448_s20 = smov 0   ;;  %s8328_s0 = inlined_call_operand.vmem [shape: f32[2,8,32], index: 0, kind: input, shape index: {}]   ;;  %s8329_s1 = inlined_call_operand.vmem [shape: bf16[2,8,32,4], index: 1, kind: input, shape index: {}]   ;;  %s8330_s2 = inlined_call_operand.vmem [shape: bf16[2,8,32,4], index: 2, kind: input, shape index: {}]   ;;  %s8331_s3 = inlined_call_operand.vmem [shape: bf16[2,8,32,4], index: 3, kind: input, shape index: {}]   ;;  %s8332_s4 = inlined_call_operand.vmem [shape: f32[2,8,1,4], index: 4, kind: input, shape index: {}]   ;;  %s8333_s5 = inlined_call_operand.vmem [shape: f32[2,8,1,4], index: 5, kind: input, shape index: {}]   ;;  %s8334_s6 = inlined_call_operand.vmem [shape: f32[2,8,1,4], index: 6, kind: input, shape index: {}]   ;;  %s8335_s7 = inlined_call_operand.vmem [shape: bf16[2,8,4,32], index: 7, kind: input, shape index: {}]   ;;  %s8336_s8 = inlined_call_operand.vmem [shape: f32[2,1,32], index: 8, kind: input, shape index: {}]   ;;  %s8337_s9 = inlined_call_operand.vmem [shape: f32[2,1,32], index: 9, kind: input, shape index: {}]   ;;  %s8338_s10 = inlined_call_operand.vmem [shape: f32[2,1,32], index: 10, kind: input, shape index: {}]   ;;  %s8339_s11 = inlined_call_operand.vmem [shape: bf16[2,32,2048], index: 11, kind: input, shape index: {}]   ;;  %s8340_s12 = inlined_call_operand.vmem [shape: f32[2,1,2048], index: 12, kind: input, shape index: {}]   ;;  %s8341_s13 = inlined_call_operand.vmem [shape: bf16[2,2048,32], index: 13, kind: input, shape index: {}]   ;;  %s8342_s14 = inlined_call_operand.vmem [shape: f32[2,1,32], index: 14, kind: input, shape index: {}]   ;;  %s8343_s15 = inlined_call_operand.vmem [shape: f32[2,1,32], index: 15, kind: input, shape index: {}]   ;;  %s8344_s16 = inlined_call_operand.vmem [shape: f32[2,1,32], index: 16, kind: input, shape index: {}]   ;;  %s8345_s17 = inlined_call_operand.vmem [shape: f32[32,16], index: 17, kind: input, shape index: {}]   ;;  %s8346_s18 = inlined_call_operand.vmem [shape: f32[1,16], index: 18, kind: input, shape index: {}]   ;;  %s8347_s19 = inlined_call_operand.vmem [shape: f32[2,8,16], index: 19, kind: output, shape index: {}]  }
   0x1   :  { %8358 = sst [smem:[#allocation14_spill]] %s8328_s0  ;;  %s7444_s0 = smov 0  }
   0x2   :  { %8359 = sst [smem:[#allocation15_spill]] %s8329_s1  ;;  %s7450_s21 = smov 0  }
   0x3   :  { %8360 = sst [smem:[#allocation16_spill]] %s8330_s2  ;;  %s7452_s1 = smov 0  }
   0x4   :  { %8361 = sst [smem:[#allocation17_spill]] %s8331_s3 }
   0x5   :  { %8362 = sst [smem:[#allocation18_spill]] %s8332_s4 }
   0x6   :  { %8363 = sst [smem:[#allocation19_spill]] %s8333_s5 }
   0x7   :  { %8364 = sst [smem:[#allocation20_spill]] %s8334_s6 }
   0x8   :  { %8365 = sst [smem:[#allocation21_spill]] %s8335_s7 }
   0x9   :  { %8366 = sst [smem:[#allocation22_spill]] %s8339_s11 }
   0xa   :  { %8367 = sst [smem:[#allocation23_spill]] %s8340_s12 }
   0xb   :  { %8368 = sst [smem:[#allocation24_spill]] %s8344_s16 }
   0xc   :  { %8369 = sst [smem:[#allocation25_spill]] %s8345_s17 }
   0xd   :  { %8370 = sst [smem:[#allocation26_spill]] %s8346_s18 }
   0xe   :  { %8371 = sst [smem:[#allocation27_spill]] %s8347_s19 }
   0xf LB: > { %8372 = sst [smem:[#allocation3_spill]] %s7321_s0  ;;  %s38_s22 = sadd.s32 1, %s7329_s20  ;;  %s7337_s1 = sphi %s7452_s1, %s29_s1   ;;  %s7333_s21 = sphi %s7450_s21, %s8412_s21   ;;  %s7329_s20 = sphi %s7448_s20, %s8411_s20   ;;  %s7325_s30 = sphi %s7446_s30, %s8410_s30   ;;  %s7321_s0 = sphi %s7444_s0, %s8409_s0  }
  0x10   : > { %8373 = sst [smem:[#allocation4_spill]] %s7329_s20  ;;  %s41_s2 = sadd.s32 1, %s7333_s21 }
  0x11   : > { %8374 = sst [smem:[#allocation5_spill]] %s7333_s21  ;;  %p39_p0 = scmp.ge.s32.totalorder %s38_s22, 2 }
  0x12   : > { %8375 = sst [smem:[#allocation6_spill]] %s7337_s1  ;;  %p6068_p1 = scmp.ge.s32.totalorder %s7337_s1, 1 }
  0x13   : > { %p692_p2 = scmp.lt.s32.totalorder %s7337_s1, 5  ;;  %s8414_s22 = smov (%p39_p0, %s38_s22), 0 }
  0x14   : > { %8376 = sst [smem:[#allocation7_spill]] %s8414_s22  ;;  %s8416_s2 = smov (!%p39_p0, %s41_s2), %s7333_s21 }
  0x15   : > { %p693_p3 = pnand %p6068_p1, %p692_p2  ;;  %p43_p4 = scmp.ge.s32.totalorder %s8416_s2, 2 }
  0x17   : > { %s8418_s2 = smov (%p43_p4, %s8416_s2), 0  ;;  %696 = sbr.rel (%p693_p3) target bundleno = 2566 (0xa06), region = 96 }
  0x18   : > { %8377 = sst [smem:[#allocation8_spill]] %s8418_s2 }
  0x1c   : > { %p810_p5 = scmp.lt.s32.totalorder %s7325_s30, 1  ;;  %p814_p6 = scmp.lt.s32.totalorder %s7321_s0, 1 }
  0x1d   : > { %s8378_s26 = sld [smem:[#allocation14_spill]] }
  0x1e   : > { %s8420_s30 = smov (!%p810_p5, %s7325_s30), 1  ;;  %s8379_s22 = sld [smem:[#allocation15_spill]] }
  0x1f   : > { %s7478_s23 = scalar_select %p814_p6, %s7321_s0, 1 }
  0x20   : > { %s6069_s24 = sshll.u32 %s8420_s30, 3  ;;  %s8380_s18 = sld [smem:[#allocation16_spill]] }
  0x21   : > { %s6387_s28 = sshll.u32 %s7478_s23, 7  ;;  %s8382_s16 = sld [smem:[#allocation17_spill]] }
  0x22   : > { %s6076_s25 = sshll.u32 %s7478_s23, 3  ;;  %s8384_s4 = sld [smem:[#allocation18_spill]] }
  0x23   : > { %s813_s27 = scalar_lea.vmem %s8378_s26, %s6069_s24  ;;  %s8386_s5 = sld [smem:[#allocation19_spill]] }
  0x24   : > { %s7487_s21 = scalar_lea.vmem %s8379_s22, %s6387_s28  ;;  %s8387_s6 = sld [smem:[#allocation20_spill]] }
  0x25   : > { %s8389_s7 = sld [smem:[#allocation21_spill]]  ;;  %s6392_s3 = sshll.u32 %s7478_s23, 10 }
  0x26   : > { %s7492_s17 = scalar_lea.vmem %s8380_s18, %s6387_s28  ;;  %s8390_s12 = sld [smem:[#allocation23_spill]] }
  0x27   : > { %8381 = sst [smem:[#allocation9_spill]] %s7492_s17  ;;  %s7497_s30 = scalar_lea.vmem %s8382_s16, %s6387_s28 }
  0x28   : > { %8383 = sst [smem:[#allocation10_spill]] %s7497_s30  ;;  %s7503_s2 = scalar_lea.vmem %s8384_s4, %s6076_s25 }
  0x29   : > { %8385 = sst [smem:[#allocation11_spill]] %s7503_s2  ;;  %s7508_s20 = scalar_lea.vmem %s8386_s5, %s6076_s25 }
  0x2a   : > { %s7513_s19 = scalar_lea.vmem %s8387_s6, %s6076_s25  ;;  %s6390_s16 = sshll.u32 %s7478_s23, 4 }
  0x2b   : > { %8388 = sst [smem:[#allocation12_spill]] %s7513_s19  ;;  %s7519_s30 = scalar_lea.vmem %s8389_s7, %s6390_s16 }
  0x2c   : > { %s6391_s25 = sshll.u32 %s7478_s23, 8  ;;  %s7537_s19 = scalar_lea.vmem %s8390_s12, %s6390_s16 }
  0x2d   : > { %8391 = sst [smem:[#allocation13_spill]] %s7537_s19  ;;  %s7548_s17 = scalar_lea.vmem %s8341_s13, %s6392_s3 }
  0x2e   : > { %s8392_s11 = sld [smem:[#allocation22_spill]]  ;;  %s871_s29 = scalar_lea.vmem %s8342_s14, %s7478_s23 }
  0x2f   : > { %s874_s6 = scalar_lea.vmem %s8343_s15, %s7478_s23  ;;  %s8393_s12 = sld [smem:[#allocation24_spill]] }
  0x30   : > { %s8395_s4 = sld [smem:[#allocation3_spill]] }
  0x34   : > { %s7542_s7 = scalar_lea.vmem %s8392_s11, %s6391_s25  ;;  %s8394_s11 = sld [smem:[#allocation27_spill]] }
  0x35   : > { %s877_s0 = scalar_lea.vmem %s8393_s12, %s7478_s23 }
  0x36   : > { %p6087_p7 = scmp.ne.s32.totalorder %s8395_s4, 0 }
  0x38   : > { %886 = sbr.rel (%p6087_p7) target bundleno = 63 (0x3f), region = 100 }
  0x3a   : > { %s7565_s19 = scalar_lea.vmem %s8394_s11, %s6069_s24 }
  0x3d   : > { %v887_v0 = vld [vmem:[%s813_s27] sm:$0xff]  ;;  %vm888_vm0 = vcmask 261120  }
  0x3e   : > { %889 = vst.msk [vmem:[#allocation2] sm:$0xff] %vm888_vm0, %v887_v0 }
  0x3f PF: > { %v7086_v1 = vld [vmem:[%s7487_s21 + $0x8] sm:$0xff]   ;;  %v7339_v2 = vmov 0.0   ;;  %v7087_v3 = vld [vmem:[%s7487_s21 + $0x18] sm:$0xff]   ;;  %v7088_v4 = vld [vmem:[%s7487_s21] sm:$0xff]   ;;  %vm7340_vm1 = vmmov 0   ;;  %vm992_vm2 = vcmask 261120   ;;  %s8401_s3 = scalar_lea.vmem %s8337_s9, %s7478_s23  ;;  %s8402_s5 = scalar_lea.vmem %s8338_s10, %s7478_s23 }
  0x40   : > { %6694 = vmatprep.subr.bf16.mxu0 %v7339_v2  ;;  %6702 = vmatprep.subr.bf16.mxu1 %v7339_v2  ;;  %v7089_v5 = vld [vmem:[%s7487_s21 + $0x10] sm:$0xff]   ;;  %v7090_v8 = vld [vmem:[%s7487_s21 + $0x28] sm:$0xff]   ;;  %v7091_v9 = vld [vmem:[%s7487_s21 + $0x38] sm:$0xff]   ;;  %s8396_s11 = sld [smem:[#allocation9_spill]]  ;;  %vm2424_vm3 = vcmask 31744   ;;  %vm2909_vm4 = vcmask 1043456  }
  0x41   : > { %6695 = vmatpush3.bf16.msra.mxu0 %v7086_v1  ;;  %6698 = vmatprep.mubr.msk.bf16.mxu0 %vm7340_vm1, %v7339_v2  ;;  %v7092_v10 = vld [vmem:[%s7487_s21 + $0x20] sm:$0xff]   ;;  %v7093_v11 = vld [vmem:[%s7487_s21 + $0x30] sm:$0xff]   ;;  %v7094_v12 = vld [vmem:[%s7487_s21 + $0x48] sm:$0xff]   ;;  %s8397_s12 = sld [smem:[#allocation10_spill]]  ;;  %vm2801_vm5 = vcmask 64512   ;;  %vm3294_vm6 = vcmask 1041408  }
  0x42   : > { %6703 = vmatpush3.bf16.msra.mxu1 %v7087_v3  ;;  %6696 = vmatprep.subr.bf16.mxu0 %v7339_v2  ;;  %v7095_v13 = vld [vmem:[%s7487_s21 + $0x58] sm:$0xff]   ;;  %v7096_v14 = vld [vmem:[%s7487_s21 + $0x40] sm:$0xff]   ;;  %v7097_v15 = vld [vmem:[%s7487_s21 + $0x50] sm:$0xff]   ;;  %s8399_s24 = sld [smem:[#allocation12_spill]] }
  0x43   : > { %6704 = vmatprep.subr.bf16.mxu1 %v7339_v2  ;;  %6706 = vmatprep.mubr.msk.bf16.mxu1 %vm7340_vm1, %v7339_v2  ;;  %v7098_v16 = vld [vmem:[%s7487_s21 + $0x68] sm:$0xff]   ;;  %v7099_v17 = vld [vmem:[%s7487_s21 + $0x78] sm:$0xff]   ;;  %v7100_v18 = vld [vmem:[%s7487_s21 + $0x60] sm:$0xff]  }
  0x44   : > { %v7101_v19 = vld [vmem:[%s7487_s21 + $0x70] sm:$0xff]   ;;  %s8398_s21 = sld [smem:[#allocation11_spill]] }
  0x45   : > { %v890_v6 = vld [vmem:[#allocation2] sm:$0xff]  ;;  %6697 = vmatpush3.bf16.msra.mxu0 %v7088_v4 }
  0x46   : > { %v7580_v7 = vpack.c.bf16 %v890_v6, %v890_v6  ;;  %6705 = vmatpush3.bf16.msra.mxu1 %v7089_v5  ;;  %6710 = vmatprep.subr.bf16.mxu0 %v7339_v2  ;;  %v7102_v20 = vld [vmem:[%s8396_s11 + $0x8] sm:$0xff]   ;;  %v7103_v21 = vld [vmem:[%s8396_s11 + $0x18] sm:$0xff]   ;;  %v7104_v22 = vld [vmem:[%s8396_s11] sm:$0xff]  }
  0x47   : > { %6718 = vmatprep.subr.bf16.mxu1 %v7339_v2  ;;  %v7105_v23 = vld [vmem:[%s8396_s11 + $0x10] sm:$0xff]   ;;  %v7106_v24 = vld [vmem:[%s8396_s11 + $0x28] sm:$0xff]   ;;  %v7107_v25 = vld [vmem:[%s8396_s11 + $0x38] sm:$0xff]  }
  0x48   : > { %6699 = vmatmul.mubr.msk.bf16.vlgmr.msra.gmra.mxu0 %vm992_vm2, %v7580_v7  ;;  %v7108_v26 = vld [vmem:[%s8396_s11 + $0x20] sm:$0xff]   ;;  %v7109_v27 = vld [vmem:[%s8396_s11 + $0x30] sm:$0xff]   ;;  %v7110_v28 = vld [vmem:[%s8396_s11 + $0x48] sm:$0xff]  }
  0x49   : > { %6707 = vmatmul.mubr.msk.bf16.vlgmr.msra.gmra.mxu1 %vm992_vm2, %v7580_v7  ;;  %6711 = vmatpush3.bf16.msra.mxu0 %v7090_v8  ;;  %v7111_v29 = vld [vmem:[%s8396_s11 + $0x58] sm:$0xff]   ;;  %v7112_v30 = vld [vmem:[%s8396_s11 + $0x40] sm:$0xff]   ;;  %v7113_v31 = vld [vmem:[%s8396_s11 + $0x50] sm:$0xff]  }
  0x4a   : > { %6719 = vmatpush3.bf16.msra.mxu1 %v7091_v9  ;;  %6712 = vmatprep.subr.bf16.mxu0 %v7339_v2  ;;  %v7114_v32 = vld [vmem:[%s8396_s11 + $0x68] sm:$0xff]   ;;  %v7115_v33 = vld [vmem:[%s8396_s11 + $0x78] sm:$0xff]   ;;  %v7116_v34 = vld [vmem:[%s8396_s11 + $0x60] sm:$0xff]  }
  0x4b   : > { %6720 = vmatprep.subr.bf16.mxu1 %v7339_v2  ;;  %6714 = vmatprep.mubr.msk.bf16.mxu0 %vm7340_vm1, %v7339_v2  ;;  %v7117_v35 = vld [vmem:[%s8396_s11 + $0x70] sm:$0xff]   ;;  %v7118_v36 = vld [vmem:[%s8397_s12 + $0x8] sm:$0xff]   ;;  %v7119_v37 = vld [vmem:[%s8397_s12] sm:$0xff]   ;;  %s8405_s11 = sld [smem:[#allocation3_spill]] }
  0x4c   : > { %6722 = vmatprep.mubr.msk.bf16.mxu1 %vm7340_vm1, %v7339_v2  ;;  %v7120_v38 = vld [vmem:[%s8397_s12 + $0x18] sm:$0xff]   ;;  %v7121_v39 = vld [vmem:[%s8397_s12 + $0x10] sm:$0xff]   ;;  %v7122_v40 = vld [vmem:[%s8397_s12 + $0x28] sm:$0xff]  }
  0x4d   : > { %6713 = vmatpush3.bf16.msra.mxu0 %v7092_v10  ;;  %v7123_v41 = vld [vmem:[%s8397_s12 + $0x20] sm:$0xff]   ;;  %v7124_v42 = vld [vmem:[%s8397_s12 + $0x38] sm:$0xff]   ;;  %v7125_v43 = vld [vmem:[%s8397_s12 + $0x30] sm:$0xff]  }
  0x4e   : > { %6721 = vmatpush3.bf16.msra.mxu1 %v7093_v11  ;;  %6726 = vmatprep.subr.bf16.mxu0 %v7339_v2  ;;  %v7126_v44 = vld [vmem:[%s8397_s12 + $0x48] sm:$0xff]   ;;  %v7127_v45 = vld [vmem:[%s8397_s12 + $0x40] sm:$0xff]   ;;  %v7128_v46 = vld [vmem:[%s8397_s12 + $0x58] sm:$0xff]  }
  0x4f   : > { %6734 = vmatprep.subr.bf16.mxu1 %v7339_v2  ;;  %v7129_v47 = vld [vmem:[%s8397_s12 + $0x50] sm:$0xff]   ;;  %v7130_v48 = vld [vmem:[%s8397_s12 + $0x68] sm:$0xff]   ;;  %v7131_v49 = vld [vmem:[%s8397_s12 + $0x60] sm:$0xff]  }
  0x50   : > { %6715 = vmatmul.mubr.msk.bf16.vlgmr.msra.gmra.mxu0 %vm992_vm2, %v7580_v7  ;;  %v7132_v50 = vld [vmem:[%s8397_s12 + $0x78] sm:$0xff]   ;;  %v7133_v51 = vld [vmem:[%s8397_s12 + $0x70] sm:$0xff]  }
  0x51   : > { %6723 = vmatmul.mubr.msk.bf16.vlgmr.msra.gmra.mxu1 %vm992_vm2, %v7580_v7  ;;  %6727 = vmatpush3.bf16.msra.mxu0 %v7094_v12  ;;  %p6382_p8 = scmp.ne.s32.totalorder %s8405_s11, 1 }
  0x52   : > { %6735 = vmatpush3.bf16.msra.mxu1 %v7095_v13  ;;  %6728 = vmatprep.subr.bf16.mxu0 %v7339_v2 }
  0x53   : > { %6736 = vmatprep.subr.bf16.mxu1 %v7339_v2  ;;  %6730 = vmatprep.mubr.msk.bf16.mxu0 %vm7340_vm1, %v7339_v2 }
  0x54   : > { %6738 = vmatprep.mubr.msk.bf16.mxu1 %vm7340_vm1, %v7339_v2 }
  0x55   : > { %6729 = vmatpush3.bf16.msra.mxu0 %v7096_v14 }
  0x56   : > { %6737 = vmatpush3.bf16.msra.mxu1 %v7097_v15  ;;  %6742 = vmatprep.subr.bf16.mxu0 %v7339_v2 }
  0x57   : > { %6750 = vmatprep.subr.bf16.mxu1 %v7339_v2 }
  0x58   : > { %6731 = vmatmul.mubr.msk.bf16.vlgmr.msra.gmra.mxu0 %vm992_vm2, %v7580_v7 }
  0x59   : > { %6739 = vmatmul.mubr.msk.bf16.vlgmr.msra.gmra.mxu1 %vm992_vm2, %v7580_v7  ;;  %6743 = vmatpush3.bf16.msra.mxu0 %v7098_v16 }
  0x5a   : > { %6751 = vmatpush3.bf16.msra.mxu1 %v7099_v17  ;;  %6744 = vmatprep.subr.bf16.mxu0 %v7339_v2 }
  0x5b   : > { %6752 = vmatprep.subr.bf16.mxu1 %v7339_v2  ;;  %6746 = vmatprep.mubr.msk.bf16.mxu0 %vm7340_vm1, %v7339_v2 }
  0x5c   : > { %6754 = vmatprep.mubr.msk.bf16.mxu1 %vm7340_vm1, %v7339_v2 }
  0x5d   : > { %6745 = vmatpush3.bf16.msra.mxu0 %v7100_v18 }
  0x5e   : > { %6753 = vmatpush3.bf16.msra.mxu1 %v7101_v19  ;;  %6758 = vmatprep.subr.bf16.mxu0 %v7339_v2 }
  0x5f   : > { %6766 = vmatprep.subr.bf16.mxu1 %v7339_v2 }
  0x60   : > { %6747 = vmatmul.mubr.msk.bf16.vlgmr.msra.gmra.mxu0 %vm992_vm2, %v7580_v7 }
  0x61   : > { %6755 = vmatmul.mubr.msk.bf16.vlgmr.msra.gmra.mxu1 %vm992_vm2, %v7580_v7  ;;  %6759 = vmatpush3.bf16.msra.mxu0 %v7102_v20  ;;  %v6120_v20 = vld [vmem:[%s7508_s20] ss:$0 sm:$0xff] }
  0x62   : > { %6767 = vmatpush3.bf16.msra.mxu1 %v7103_v21  ;;  %6760 = vmatprep.subr.bf16.mxu0 %v7339_v2 }
  0x63   : > { %6768 = vmatprep.subr.bf16.mxu1 %v7339_v2  ;;  %6762 = vmatprep.mubr.msk.bf16.mxu0 %vm7340_vm1, %v7339_v2 }
  0x64   : > { %6770 = vmatprep.mubr.msk.bf16.mxu1 %vm7340_vm1, %v7339_v2 }
  0x65   : > { %6761 = vmatpush3.bf16.msra.mxu0 %v7104_v22  ;;  %v6121_v22 = vld [vmem:[%s7508_s20 + $0x1] ss:$0 sm:$0xff] }
  0x66   : > { %6769 = vmatpush3.bf16.msra.mxu1 %v7105_v23  ;;  %6774 = vmatprep.subr.bf16.mxu0 %v7339_v2 }
  0x67   : > { %6782 = vmatprep.subr.bf16.mxu1 %v7339_v2 }
  0x68   : > { %6763 = vmatmul.mubr.msk.bf16.vlgmr.msra.gmra.mxu0 %vm992_vm2, %v7580_v7 }
  0x69   : > { %6771 = vmatmul.mubr.msk.bf16.vlgmr.msra.gmra.mxu1 %vm992_vm2, %v7580_v7  ;;  %6775 = vmatpush3.bf16.msra.mxu0 %v7106_v24 }
  0x6a   : > { %6783 = vmatpush3.bf16.msra.mxu1 %v7107_v25  ;;  %6776 = vmatprep.subr.bf16.mxu0 %v7339_v2 }
  0x6b   : > { %6784 = vmatprep.subr.bf16.mxu1 %v7339_v2  ;;  %6778 = vmatprep.mubr.msk.bf16.mxu0 %vm7340_vm1, %v7339_v2 }
  0x6c   : > { %6786 = vmatprep.mubr.msk.bf16.mxu1 %vm7340_vm1, %v7339_v2 }
  0x6d   : > { %6777 = vmatpush3.bf16.msra.mxu0 %v7108_v26 }
  0x6e   : > { %6785 = vmatpush3.bf16.msra.mxu1 %v7109_v27  ;;  %6790 = vmatprep.subr.bf16.mxu0 %v7339_v2 }
  0x6f   : > { %6798 = vmatprep.subr.bf16.mxu1 %v7339_v2 }
  0x70   : > { %6779 = vmatmul.mubr.msk.bf16.vlgmr.msra.gmra.mxu0 %vm992_vm2, %v7580_v7 }
  0x71   : > { %6787 = vmatmul.mubr.msk.bf16.vlgmr.msra.gmra.mxu1 %vm992_vm2, %v7580_v7  ;;  %6791 = vmatpush3.bf16.msra.mxu0 %v7110_v28 }
  0x72   : > { %6799 = vmatpush3.bf16.msra.mxu1 %v7111_v29  ;;  %6792 = vmatprep.subr.bf16.mxu0 %v7339_v2 }
  0x73   : > { %6800 = vmatprep.subr.bf16.mxu1 %v7339_v2  ;;  %6794 = vmatprep.mubr.msk.bf16.mxu0 %vm7340_vm1, %v7339_v2 }
  0x74   : > { %6802 = vmatprep.mubr.msk.bf16.mxu1 %vm7340_vm1, %v7339_v2 }
  0x75   : > { %6793 = vmatpush3.bf16.msra.mxu0 %v7112_v30  ;;  %v6088_v30 = vld [vmem:[%s8398_s21] ss:$0 sm:$0xff] }
  0x76   : > { %6801 = vmatpush3.bf16.msra.mxu1 %v7113_v31  ;;  %6806 = vmatprep.subr.bf16.mxu0 %v7339_v2 }
  0x77   : > { %6814 = vmatprep.subr.bf16.mxu1 %v7339_v2 }
  0x78   : > { %6795 = vmatmul.mubr.msk.bf16.vlgmr.msra.gmra.mxu0 %vm992_vm2, %v7580_v7 }
  0x79   : > { %6803 = vmatmul.mubr.msk.bf16.vlgmr.msra.gmra.mxu1 %vm992_vm2, %v7580_v7  ;;  %6807 = vmatpush3.bf16.msra.mxu0 %v7114_v32 }
  0x7a   : > { %6815 = vmatpush3.bf16.msra.mxu1 %v7115_v33  ;;  %6808 = vmatprep.subr.bf16.mxu0 %v7339_v2  ;;  %v6089_v33 = vld [vmem:[%s8398_s21 + $0x1] ss:$0 sm:$0xff] }
  0x7b   : > { %6816 = vmatprep.subr.bf16.mxu1 %v7339_v2  ;;  %6810 = vmatprep.mubr.msk.bf16.mxu0 %vm7340_vm1, %v7339_v2 }
  0x7c   : > { %6818 = vmatprep.mubr.msk.bf16.mxu1 %vm7340_vm1, %v7339_v2 }
  0x7d   : > { %6809 = vmatpush3.bf16.msra.mxu0 %v7116_v34 }
  0x7e   : > { %6817 = vmatpush3.bf16.msra.mxu1 %v7117_v35  ;;  %6822 = vmatprep.subr.bf16.mxu0 %v7339_v2 }
  0x7f   : > { %6830 = vmatprep.subr.bf16.mxu1 %v7339_v2 }
  0x80   : > { %6811 = vmatmul.mubr.msk.bf16.vlgmr.msra.gmra.mxu0 %vm992_vm2, %v7580_v7 }
  0x81   : > { %6819 = vmatmul.mubr.msk.bf16.vlgmr.msra.gmra.mxu1 %vm992_vm2, %v7580_v7  ;;  %6826 = vmatprep.mubr.msk.bf16.mxu0 %vm7340_vm1, %v7339_v2 }
  0x82   : > { %6834 = vmatprep.mubr.msk.bf16.mxu1 %vm7340_vm1, %v7339_v2  ;;  %6823 = vmatpush3.bf16.msra.mxu0 %v7118_v36 }
  0x83   : > { %6824 = vmatprep.subr.bf16.mxu0 %v7339_v2  ;;  %6831 = vmatpush3.bf16.msra.mxu1 %v7120_v38  ;;  %v6122_v38 = vld [vmem:[%s7508_s20 + $0x2] ss:$0 sm:$0xff] }
  0x84   : > { %6832 = vmatprep.subr.bf16.mxu1 %v7339_v2 }
  0x86   : > { %6825 = vmatpush3.bf16.msra.mxu0 %v7119_v37 }
  0x87   : > { %6838 = vmatprep.subr.bf16.mxu0 %v7339_v2  ;;  %6833 = vmatpush3.bf16.msra.mxu1 %v7121_v39 }
  0x88   : > { %6846 = vmatprep.subr.bf16.mxu1 %v7339_v2 }
  0x89   : > { %6827 = vmatmul.mubr.msk.bf16.vlgmr.msra.gmra.mxu0 %vm992_vm2, %v7580_v7 }
  0x8a   : > { %6839 = vmatpush3.bf16.msra.mxu0 %v7122_v40  ;;  %6842 = vmatprep.mubr.msk.bf16.mxu0 %vm7340_vm1, %v7339_v2 }
  0x8b   : > { %6840 = vmatprep.subr.bf16.mxu0 %v7339_v2  ;;  %6835 = vmatmul.mubr.msk.bf16.vlgmr.msra.gmra.mxu1 %vm992_vm2, %v7580_v7 }
  0x8c   : > { %6847 = vmatpush3.bf16.msra.mxu1 %v7124_v42  ;;  %6850 = vmatprep.mubr.msk.bf16.mxu1 %vm7340_vm1, %v7339_v2 }
  0x8d   : > { %6848 = vmatprep.subr.bf16.mxu1 %v7339_v2 }
  0x8e   : > { %6841 = vmatpush3.bf16.msra.mxu0 %v7123_v41  ;;  %v6123_v41 = vld [vmem:[%s7508_s20 + $0x3] ss:$0 sm:$0xff] }
  0x8f   : > { %6854 = vmatprep.subr.bf16.mxu0 %v7339_v2 }
  0x90   : > { %6849 = vmatpush3.bf16.msra.mxu1 %v7125_v43 }
  0x91   : > { %6843 = vmatmul.mubr.msk.bf16.vlgmr.msra.gmra.mxu0 %vm992_vm2, %v7580_v7  ;;  %6862 = vmatprep.subr.bf16.mxu1 %v7339_v2 }
  0x92   : > { %6855 = vmatpush3.bf16.msra.mxu0 %v7126_v44  ;;  %6858 = vmatprep.mubr.msk.bf16.mxu0 %vm7340_vm1, %v7339_v2 }
  0x93   : > { %6856 = vmatprep.subr.bf16.mxu0 %v7339_v2  ;;  %6851 = vmatmul.mubr.msk.bf16.vlgmr.msra.gmra.mxu1 %vm992_vm2, %v7580_v7 }
  0x94   : > { %6863 = vmatpush3.bf16.msra.mxu1 %v7128_v46  ;;  %6866 = vmatprep.mubr.msk.bf16.mxu1 %vm7340_vm1, %v7339_v2 }
  0x95   : > { %6864 = vmatprep.subr.bf16.mxu1 %v7339_v2 }
  0x96   : > { %6857 = vmatpush3.bf16.msra.mxu0 %v7127_v45 }
  0x97   : > { %6870 = vmatprep.subr.bf16.mxu0 %v7339_v2 }
  0x98   : > { %6865 = vmatpush3.bf16.msra.mxu1 %v7129_v47 }
  0x99   : > { %6859 = vmatmul.mubr.msk.bf16.vlgmr.msra.gmra.mxu0 %vm992_vm2, %v7580_v7  ;;  %6878 = vmatprep.subr.bf16.mxu1 %v7339_v2 }
  0x9a   : > { %6871 = vmatpush3.bf16.msra.mxu0 %v7130_v48  ;;  %6874 = vmatprep.mubr.msk.bf16.mxu0 %vm7340_vm1, %v7339_v2 }
  0x9b   : > { %6872 = vmatprep.subr.bf16.mxu0 %v7339_v2  ;;  %6867 = vmatmul.mubr.msk.bf16.vlgmr.msra.gmra.mxu1 %vm992_vm2, %v7580_v7 }
  0x9c   : > { %6879 = vmatpush3.bf16.msra.mxu1 %v7132_v50  ;;  %6882 = vmatprep.mubr.msk.bf16.mxu1 %vm7340_vm1, %v7339_v2 }
  0x9d   : > { %6880 = vmatprep.subr.bf16.mxu1 %v7339_v2 }
  0x9e   : > { %6873 = vmatpush3.bf16.msra.mxu0 %v7131_v49 }
  0x9f   : > { %6886 = vmatprep.subr.bf16.mxu0 %v7339_v2 }
  0xa0   : > { %6881 = vmatpush3.bf16.msra.mxu1 %v7133_v51 }
  0xa1   : > { %6875 = vmatmul.mubr.msk.bf16.vlgmr.msra.gmra.mxu0 %vm992_vm2, %v7580_v7  ;;  %6892 = vmatprep.subr.bf16.mxu1 %v7339_v2 }
  0xa2   : > { %6888 = vmatprep.mubr.msk.bf16.mxu0 %vm7340_vm1, %v7339_v2 }
  0xa3   : > { %6883 = vmatmul.mubr.msk.bf16.vlgmr.msra.gmra.mxu1 %vm992_vm2, %v7580_v7 }
  0xa4   : > { %6894 = vmatprep.mubr.msk.bf16.mxu1 %vm7340_vm1, %v7339_v2 }
 0x108   : > { %v1030_v52 = vpop.f32.mrf.mxu0 }
 0x109   : > { %v1082_v53 = vpop.f32.mrf.mxu1  ;;  %v1031_v39 = vadd.f32 %v6088_v30, %v1030_v52  ;;  %v6090_v52 = vld [vmem:[%s8398_s21 + $0x2] ss:$0 sm:$0xff] }
 0x10a   : > { %v6700_v54 = vpop.f32.mrf.mxu0  ;;  %v1083_v42 = vadd.f32 %v6089_v33, %v1082_v53 }
 0x10b   : > { %v6708_v55 = vpop.f32.mrf.mxu1  ;;  %v2408_v48 = vpack.c.bf16 %v1031_v39, %v1031_v39 }
 0x10c   : > { %v1033_v56 = vpop.f32.mrf.mxu0  ;;  %v2409_v51 = vpack.c.bf16 %v1083_v42, %v1083_v42 }
 0x10d   : > { %v1085_v57 = vpop.f32.mrf.mxu1  ;;  %v6091_v56 = vld [vmem:[%s8398_s21 + $0x3] ss:$0 sm:$0xff] }
 0x10e   : > { %v6701_v58 = vpop.f32.mrf.mxu0 }
 0x10f   : > { %v6709_v59 = vpop.f32.mrf.mxu1 }
 0x110   : > { %v7768_v60 = vpop.f32.mrf.mxu0 }
 0x111   : > { %v7770_v61 = vpop.f32.mrf.mxu1 }
 0x112   : > { %v6716_v62 = vpop.f32.mrf.mxu0 }
 0x113   : > { %v6724_v63 = vpop.f32.mrf.mxu1  ;;  %v6124_v62 = vld [vmem:[%s7508_s20 + $0x4] ss:$0 sm:$0xff] }
 0x114   : > { %v1137_v0 = vpop.f32.mrf.mxu0  ;;  %v1135_v63 = vadd.f32 %v6090_v52, %v7768_v60 }
 0x115   : > { %v1189_v1 = vpop.f32.mrf.mxu1 }
 0x116   : > { %v6717_v3 = vpop.f32.mrf.mxu0  ;;  %v6125_v1 = vld [vmem:[%s7508_s20 + $0x5] ss:$0 sm:$0xff] }
 0x117   : > { %v6725_v4 = vpop.f32.mrf.mxu1  ;;  %v1187_v3 = vadd.f32 %v6091_v56, %v7770_v61  ;;  %v6092_v61 = vld [vmem:[%s8398_s21 + $0x4] ss:$0 sm:$0xff] }
 0x118   : > { %v7772_v5 = vpop.f32.mrf.mxu0 }
 0x119   : > { %v7774_v6 = vpop.f32.mrf.mxu1 }
 0x11a   : > { %v6732_v7 = vpop.f32.mrf.mxu0 }
 0x11b   : > { %v6740_v8 = vpop.f32.mrf.mxu1 }
 0x11c   : > { %v1241_v9 = vpop.f32.mrf.mxu0 }
 0x11d   : > { %v1293_v10 = vpop.f32.mrf.mxu1 }
 0x11e   : > { %v6733_v11 = vpop.f32.mrf.mxu0  ;;  %v2410_v10 = vpack.c.bf16 %v1135_v63, %v1135_v63 }
 0x11f   : > { %v6741_v12 = vpop.f32.mrf.mxu1 }
 0x120   : > { %v7776_v13 = vpop.f32.mrf.mxu0 }
 0x121   : > { %v7778_v14 = vpop.f32.mrf.mxu1 }
 0x122   : > { %v6748_v15 = vpop.f32.mrf.mxu0 }
 0x123   : > { %v6756_v16 = vpop.f32.mrf.mxu1  ;;  %v2411_v15 = vpack.c.bf16 %v1187_v3, %v1187_v3 }
 0x124   : > { %v1345_v17 = vpop.f32.mrf.mxu0 }
 0x125   : > { %v1397_v18 = vpop.f32.mrf.mxu1 }
 0x126   : > { %v6749_v19 = vpop.f32.mrf.mxu0  ;;  %v6093_v18 = vld [vmem:[%s8398_s21 + $0x5] ss:$0 sm:$0xff] }
 0x127   : > { %v6757_v21 = vpop.f32.mrf.mxu1 }
 0x128   : > { %v1534_v23 = vpop.f32.mrf.mxu0 }
 0x129   : > { %v1535_v24 = vadd.f32 %v6120_v20, %v1534_v23  ;;  %v1586_v25 = vpop.f32.mrf.mxu1  ;;  %v6126_v23 = vld [vmem:[%s7508_s20 + $0x6] ss:$0 sm:$0xff] }
 0x12a   : > { %v1587_v26 = vadd.f32 %v6121_v22, %v1586_v25  ;;  %v6764_v27 = vpop.f32.mrf.mxu0 }
 0x12b   : > { %v2416_v28 = vpack.c.bf16 %v1535_v24, %v1535_v24  ;;  %v6772_v29 = vpop.f32.mrf.mxu1  ;;  %v1239_v24 = vadd.f32 %v6092_v61, %v7772_v5  ;;  %v1291_v27 = vadd.f32 %v6093_v18, %v7774_v6  ;;  %v6156_v61 = vld [vmem:[%s8399_s24 + $0x4] ss:$0 sm:$0xff] }
 0x12c   : > { %v2417_v31 = vpack.c.bf16 %v1587_v26, %v1587_v26  ;;  %v1537_v32 = vpop.f32.mrf.mxu0  ;;  %v6127_v26 = vld [vmem:[%s7508_s20 + $0x7] ss:$0 sm:$0xff]  ;;  %s8400_s20 = scalar_lea.vmem %s8336_s8, %s7478_s23 }
 0x12d   : > { %v2429_v34 = vsel %vm2424_vm3, %v2416_v28, 0  ;;  %v1589_v35 = vpop.f32.mrf.mxu1  ;;  %v2412_v32 = vpack.c.bf16 %v1239_v24, %v1239_v24 }
 0x12e   : > { %v2475_v36 = vsel %vm2424_vm3, %v2417_v31, 0  ;;  %v6765_v37 = vpop.f32.mrf.mxu0  ;;  %6887 = vmatpush3.bf16.xpose.msra.mxu0 %v2429_v34  ;;  %v2413_v35 = vpack.c.bf16 %v1291_v27, %v1291_v27 }
 0x12f   : > { %v6773_v40 = vpop.f32.mrf.mxu1  ;;  %6893 = vmatpush3.bf16.xpose.msra.mxu1 %v2475_v36  ;;  %6898 = vmatprep.subr.bf16.mxu0 %v7339_v2  ;;  %v6094_v36 = vld [vmem:[%s8398_s21 + $0x6] ss:$0 sm:$0xff] }
 0x130   : > { %v1638_v43 = vpop.f32.mrf.mxu0  ;;  %6904 = vmatprep.subr.bf16.mxu1 %v7339_v2 }
 0x131   : > { %v1639_v44 = vadd.f32 %v6122_v38, %v1638_v43  ;;  %v1690_v45 = vpop.f32.mrf.mxu1  ;;  %v6095_v38 = vld [vmem:[%s8398_s21 + $0x7] ss:$0 sm:$0xff]  ;;  %v1343_v43 = vadd.f32 %v6094_v36, %v7776_v13  ;;  %v6152_v13 = vld [vmem:[%s8399_s24] ss:$0 sm:$0xff] }
 0x132   : > { %v1691_v46 = vadd.f32 %v6123_v41, %v1690_v45  ;;  %v6780_v47 = vpop.f32.mrf.mxu0  ;;  %v1395_v45 = vadd.f32 %v6095_v38, %v7778_v14 }
 0x133   : > { %v2418_v49 = vpack.c.bf16 %v1639_v44, %v1639_v44  ;;  %v6788_v50 = vpop.f32.mrf.mxu1 }
 0x134   : > { %v2419_v54 = vpack.c.bf16 %v1691_v46, %v1691_v46  ;;  %v1641_v55 = vpop.f32.mrf.mxu0  ;;  %v2414_v46 = vpack.c.bf16 %v1343_v43, %v1343_v43  ;;  %v2415_v47 = vpack.c.bf16 %v1395_v45, %v1395_v45  ;;  %v6153_v50 = vld [vmem:[%s8399_s24 + $0x1] ss:$0 sm:$0xff] }
 0x135   : > { %v2521_v57 = vsel %vm2424_vm3, %v2418_v49, 0  ;;  %v1693_v53 = vpop.f32.mrf.mxu1  ;;  %6889 = vmatmul.mubr.msk.bf16.vlgmr.msra.gmra.mxu0 %vm2424_vm3, %v2408_v48 }
 0x136   : > { %v2567_v58 = vsel %vm2424_vm3, %v2419_v54, 0  ;;  %6895 = vmatmul.mubr.msk.bf16.vlgmr.msra.gmra.mxu1 %vm2424_vm3, %v2409_v51  ;;  %v6781_v59 = vpop.f32.mrf.mxu0  ;;  %6899 = vmatpush3.bf16.xpose.msra.mxu0 %v2521_v57 }
 0x137   : > { %v6789_v0 = vpop.f32.mrf.mxu1  ;;  %6905 = vmatpush3.bf16.xpose.msra.mxu1 %v2567_v58  ;;  %6900 = vmatprep.mubr.msk.bf16.mxu0 %vm7340_vm1, %v7339_v2  ;;  %v6154_v58 = vld [vmem:[%s8399_s24 + $0x2] ss:$0 sm:$0xff] }
 0x138   : > { %v1742_v4 = vpop.f32.mrf.mxu0  ;;  %6906 = vmatprep.mubr.msk.bf16.mxu1 %vm7340_vm1, %v7339_v2  ;;  %6910 = vmatprep.subr.bf16.mxu0 %v7339_v2 }
 0x139   : > { %v1743_v7 = vadd.f32 %v6124_v62, %v1742_v4  ;;  %v1794_v8 = vpop.f32.mrf.mxu1  ;;  %6916 = vmatprep.subr.bf16.mxu1 %v7339_v2 }
 0x13a   : > { %v1795_v60 = vadd.f32 %v6125_v1, %v1794_v8  ;;  %v6796_v9 = vpop.f32.mrf.mxu0 }
 0x13b   : > { %v2420_v11 = vpack.c.bf16 %v1743_v7, %v1743_v7  ;;  %v6804_v12 = vpop.f32.mrf.mxu1  ;;  %v6155_v7 = vld [vmem:[%s8399_s24 + $0x3] ss:$0 sm:$0xff] }
 0x13c   : > { %v2421_v16 = vpack.c.bf16 %v1795_v60, %v1795_v60  ;;  %v1745_v17 = vpop.f32.mrf.mxu0 }
 0x13d   : > { %v2613_v19 = vsel %vm2424_vm3, %v2420_v11, 0  ;;  %v1797_v20 = vpop.f32.mrf.mxu1  ;;  %6901 = vmatmul.mubr.msk.bf16.vlgmr.msra.gmra.mxu0 %vm2424_vm3, %v2410_v10 }
 0x13e   : > { %v2659_v21 = vsel %vm2424_vm3, %v2421_v16, 0  ;;  %6907 = vmatmul.mubr.msk.bf16.vlgmr.msra.gmra.mxu1 %vm2424_vm3, %v2411_v15  ;;  %v6797_v22 = vpop.f32.mrf.mxu0  ;;  %6911 = vmatpush3.bf16.xpose.msra.mxu0 %v2613_v19 }
 0x13f   : > { %v6805_v25 = vpop.f32.mrf.mxu1  ;;  %6917 = vmatpush3.bf16.xpose.msra.mxu1 %v2659_v21  ;;  %6912 = vmatprep.mubr.msk.bf16.mxu0 %vm7340_vm1, %v7339_v2 }
 0x140   : > { %v1846_v28 = vpop.f32.mrf.mxu0  ;;  %6918 = vmatprep.mubr.msk.bf16.mxu1 %vm7340_vm1, %v7339_v2  ;;  %6922 = vmatprep.subr.bf16.mxu0 %v7339_v2 }
 0x141   : > { %v1847_v29 = vadd.f32 %v6126_v23, %v1846_v28  ;;  %v1898_v30 = vpop.f32.mrf.mxu1  ;;  %6928 = vmatprep.subr.bf16.mxu1 %v7339_v2  ;;  %v6157_v23 = vld [vmem:[%s8399_s24 + $0x5] ss:$0 sm:$0xff] }
 0x142   : > { %v1899_v5 = vadd.f32 %v6127_v26, %v1898_v30  ;;  %v6812_v31 = vpop.f32.mrf.mxu0 }
 0x143   : > { %v2422_v33 = vpack.c.bf16 %v1847_v29, %v1847_v29  ;;  %v6820_v34 = vpop.f32.mrf.mxu1 }
 0x144   : > { %v2423_v37 = vpack.c.bf16 %v1899_v5, %v1899_v5  ;;  %v1849_v6 = vpop.f32.mrf.mxu0  ;;  %v6158_v5 = vld [vmem:[%s8399_s24 + $0x6] ss:$0 sm:$0xff] }
 0x145   : > { %v2705_v39 = vsel %vm2424_vm3, %v2422_v33, 0  ;;  %v1901_v40 = vpop.f32.mrf.mxu1  ;;  %6913 = vmatmul.mubr.msk.bf16.vlgmr.msra.gmra.mxu0 %vm2424_vm3, %v2412_v32  ;;  %v6159_v6 = vld [vmem:[%s8399_s24 + $0x7] ss:$0 sm:$0xff]  ;;  %s8406_s24 = sld [smem:[#allocation25_spill]] (!%p6382_p8) }
 0x146   : > { %v2751_v41 = vsel %vm2424_vm3, %v2423_v37, 0  ;;  %6919 = vmatmul.mubr.msk.bf16.vlgmr.msra.gmra.mxu1 %vm2424_vm3, %v2413_v35  ;;  %v6813_v42 = vpop.f32.mrf.mxu0  ;;  %6923 = vmatpush3.bf16.xpose.msra.mxu0 %v2705_v39 }
 0x147   : > { %v6821_v44 = vpop.f32.mrf.mxu1  ;;  %6929 = vmatpush3.bf16.xpose.msra.mxu1 %v2751_v41  ;;  %6924 = vmatprep.mubr.msk.bf16.mxu0 %vm7340_vm1, %v7339_v2 }
 0x148   : > { %6930 = vmatprep.mubr.msk.bf16.mxu1 %vm7340_vm1, %v7339_v2  ;;  %6934 = vmatprep.subr.bf16.mxu0 %v7339_v2 }
 0x149   : > { %6940 = vmatprep.subr.bf16.mxu1 %v7339_v2  ;;  %v2038_v14 = vpop.f32.mrf.mxu0 }
 0x14a   : > { %v2039_v48 = vadd.f32 %v6152_v13, %v2038_v14 }
 0x14b   : > { %v6828_v49 = vpop.f32.mrf.mxu0  ;;  %v2090_v54 = vpop.f32.mrf.mxu1 }
 0x14c   : > { %v2898_v51 = vpack.c.bf16 %v2039_v48, %v2039_v48  ;;  %v2091_v56 = vadd.f32 %v6153_v50, %v2090_v54 }
 0x14d   : > { %6925 = vmatmul.mubr.msk.bf16.vlgmr.msra.gmra.mxu0 %vm2424_vm3, %v2414_v46  ;;  %v2041_v52 = vpop.f32.mrf.mxu0  ;;  %v6836_v53 = vpop.f32.mrf.mxu1 }
 0x14e   : > { %6931 = vmatmul.mubr.msk.bf16.vlgmr.msra.gmra.mxu1 %vm2424_vm3, %v2415_v47  ;;  %6936 = vmatprep.mubr.msk.bf16.mxu0 %vm7340_vm1, %v7339_v2  ;;  %v2911_v55 = vsel %vm2909_vm4, %v2898_v51, 0  ;;  %v2899_v59 = vpack.c.bf16 %v2091_v56, %v2091_v56 }
 0x14f   : > { %6942 = vmatprep.mubr.msk.bf16.mxu1 %vm7340_vm1, %v7339_v2  ;;  %v6829_v57 = vpop.f32.mrf.mxu0  ;;  %6935 = vmatpush3.bf16.msra.mxu0 %v2911_v55  ;;  %v2093_v62 = vpop.f32.mrf.mxu1 }
 0x150   : > { %6946 = vmatprep.subr.bf16.mxu0 %v7339_v2  ;;  %v2957_v0 = vsel %vm2909_vm4, %v2899_v59, 0 }
 0x151   : > { %v2142_v63 = vpop.f32.mrf.mxu0  ;;  %v6837_v3 = vpop.f32.mrf.mxu1  ;;  %6941 = vmatpush3.bf16.msra.mxu1 %v2957_v0 }
 0x152   : > { %v2143_v1 = vadd.f32 %v6154_v58, %v2142_v63  ;;  %6952 = vmatprep.subr.bf16.mxu1 %v7339_v2 }
 0x153   : > { %v6844_v4 = vpop.f32.mrf.mxu0  ;;  %v2194_v9 = vpop.f32.mrf.mxu1 }
 0x154   : > { %v2900_v8 = vpack.c.bf16 %v2143_v1, %v2143_v1  ;;  %v2195_v11 = vadd.f32 %v6155_v7, %v2194_v9 }
 0x155   : > { %v2145_v60 = vpop.f32.mrf.mxu0  ;;  %v6852_v15 = vpop.f32.mrf.mxu1 }
 0x156   : > { %v7851_v10 = vsel %vm2909_vm4, %v2900_v8, 0  ;;  %v2901_v16 = vpack.c.bf16 %v2195_v11, %v2195_v11 }
 0x157   : > { %v6845_v12 = vpop.f32.mrf.mxu0  ;;  %v2197_v17 = vpop.f32.mrf.mxu1 }
 0x158   : > { %v7855_v19 = vsel %vm2909_vm4, %v2901_v16, 0 }
 0x159   : > { %v2246_v18 = vpop.f32.mrf.mxu0  ;;  %v6853_v21 = vpop.f32.mrf.mxu1 }
 0x15a   : > { %v2247_v20 = vadd.f32 %v6156_v61, %v2246_v18 }
 0x15b   : > { %v6860_v22 = vpop.f32.mrf.mxu0  ;;  %v2298_v26 = vpop.f32.mrf.mxu1 }
 0x15c   : > { %v2902_v24 = vpack.c.bf16 %v2247_v20, %v2247_v20  ;;  %v2299_v28 = vadd.f32 %v6157_v23, %v2298_v26 }
 0x15d   : > { %v2249_v25 = vpop.f32.mrf.mxu0  ;;  %v6868_v30 = vpop.f32.mrf.mxu1 }
 0x15e   : > { %v7859_v27 = vsel %vm2909_vm4, %v2902_v24, 0  ;;  %v2903_v31 = vpack.c.bf16 %v2299_v28, %v2299_v28 }
 0x15f   : > { %v6861_v29 = vpop.f32.mrf.mxu0  ;;  %v2301_v32 = vpop.f32.mrf.mxu1 }
 0x160   : > { %v7863_v34 = vsel %vm2909_vm4, %v2903_v31, 0 }
 0x161   : > { %v2350_v33 = vpop.f32.mrf.mxu0  ;;  %v6869_v36 = vpop.f32.mrf.mxu1 }
 0x162   : > { %v2351_v35 = vadd.f32 %v6158_v5, %v2350_v33 }
 0x163   : > { %v6876_v37 = vpop.f32.mrf.mxu0  ;;  %v2402_v40 = vpop.f32.mrf.mxu1 }
 0x164   : > { %v2904_v38 = vpack.c.bf16 %v2351_v35, %v2351_v35  ;;  %v2403_v42 = vadd.f32 %v6159_v6, %v2402_v40 }
 0x165   : > { %v2353_v39 = vpop.f32.mrf.mxu0  ;;  %v6884_v44 = vpop.f32.mrf.mxu1 }
 0x166   : > { %v7867_v41 = vsel %vm2909_vm4, %v2904_v38, 0  ;;  %v2905_v45 = vpack.c.bf16 %v2403_v42, %v2403_v42 }
 0x167   : > { %v6877_v43 = vpop.f32.mrf.mxu0  ;;  %v2405_v46 = vpop.f32.mrf.mxu1 }
 0x168   : > { %v7870_v47 = vsel %vm2909_vm4, %v2905_v45, 0 }
 0x169   : > { %v6885_v13 = vpop.f32.mrf.mxu1 }
 0x1f5   : > { %v2465_v14 = vpop.f32.mrf.mxu0 }
 0x1f6   : > { %v2793_v48 = vmul.f32 0.5, %v2465_v14  ;;  %v2511_v49 = vpop.f32.mrf.mxu1 }
 0x1f7   : > { %v6890_v50 = vpop.f32.mrf.mxu0  ;;  %v2794_v51 = vmul.f32 0.5, %v2511_v49 }
 0x1f8   : > { %v6896_v52 = vpop.f32.mrf.mxu1  ;;  %v2802_v54 = vsel %vm2801_vm5, %v2793_v48, -inf }
 0x1f9   : > { %2803 = vmax.xlane.f32.xlu0 %v2802_v54  ;;  %v2468_v55 = vpop.f32.mrf.mxu0  ;;  %v2805_v58 = vsel %vm2801_vm5, %v2794_v51, -inf }
 0x1fa   : > { %v2514_v56 = vpop.f32.mrf.mxu1 }
 0x1fb   : > { %v6891_v57 = vpop.f32.mrf.mxu0 }
 0x1fc   : > { %v6897_v53 = vpop.f32.mrf.mxu1 }
 0x1fd   : > { %2806 = vmax.xlane.f32.xlu0 %v2805_v58  ;;  %v2557_v59 = vpop.f32.mrf.mxu0 }
 0x1fe   : > { %v2603_v62 = vpop.f32.mrf.mxu1  ;;  %v2795_v63 = vmul.f32 0.5, %v2557_v59 }
 0x1ff   : > { %v6902_v0 = vpop.f32.mrf.mxu0  ;;  %v2796_v1 = vmul.f32 0.5, %v2603_v62 }
 0x200   : > { %v6908_v3 = vpop.f32.mrf.mxu1  ;;  %v2808_v4 = vsel %vm2801_vm5, %v2795_v63, -inf }
 0x201   : > { %2809 = vmax.xlane.f32.xlu1 %v2808_v4  ;;  %v2560_v7 = vpop.f32.mrf.mxu0  ;;  %v2811_v11 = vsel %vm2801_vm5, %v2796_v1, -inf }
 0x202   : > { %v2606_v8 = vpop.f32.mrf.mxu1 }
 0x203   : > { %v6903_v60 = vpop.f32.mrf.mxu0 }
 0x204   : > { %v6909_v9 = vpop.f32.mrf.mxu1 }
 0x205   : > { %2812 = vmax.xlane.f32.xlu1 %v2811_v11  ;;  %v2649_v12 = vpop.f32.mrf.mxu0 }
 0x206   : > { %v2695_v15 = vpop.f32.mrf.mxu1  ;;  %v2797_v61 = vmul.f32 0.5, %v2649_v12 }
 0x207   : > { %v2798_v16 = vmul.f32 0.5, %v2695_v15  ;;  %v6914_v17 = vpop.f32.mrf.mxu0 }
 0x208   : > { %v6920_v18 = vpop.f32.mrf.mxu1  ;;  %v2814_v20 = vsel %vm2801_vm5, %v2797_v61, -inf }
 0x209   : > { %v2817_v21 = vsel %vm2801_vm5, %v2798_v16, -inf  ;;  %2815 = vmax.xlane.f32.xlu0 %v2814_v20  ;;  %v2652_v22 = vpop.f32.mrf.mxu0 }
 0x20a   : > { %v2698_v23 = vpop.f32.mrf.mxu1  ;;  %2818 = vmax.xlane.f32.xlu1 %v2817_v21 }
 0x20b   : > { %v6915_v24 = vpop.f32.mrf.mxu0 }
 0x20c   : > { %v6921_v25 = vpop.f32.mrf.mxu1 }
 0x20d   : > { %v2741_v26 = vpop.f32.mrf.mxu0 }
 0x20e   : > { %v2799_v28 = vmul.f32 0.5, %v2741_v26  ;;  %v2787_v29 = vpop.f32.mrf.mxu1 }
 0x20f   : > { %v2800_v30 = vmul.f32 0.5, %v2787_v29  ;;  %v6926_v5 = vpop.f32.mrf.mxu0 }
 0x210   : > { %v6932_v31 = vpop.f32.mrf.mxu1  ;;  %v2820_v32 = vsel %vm2801_vm5, %v2799_v28, -inf }
 0x211   : > { %v2823_v33 = vsel %vm2801_vm5, %v2800_v30, -inf  ;;  %2821 = vmax.xlane.f32.xlu0 %v2820_v32  ;;  %v2744_v35 = vpop.f32.mrf.mxu0 }
 0x212   : > { %v2790_v36 = vpop.f32.mrf.mxu1  ;;  %2824 = vmax.xlane.f32.xlu1 %v2823_v33 }
 0x213   : > { %v6927_v37 = vpop.f32.mrf.mxu0 }
 0x214   : > { %v6933_v6 = vpop.f32.mrf.mxu1 }
 0x282   : > { %v2804_v38 = vpop.xlane.xlu0 %2803 }
 0x283   : > { %v2826_v39 = vsub.f32 %v2793_v48, %v2804_v38 }
 0x285   : > { %v2834_v40 = vmul.f32 1.442695, %v2826_v39 }
 0x286   : > { %v2807_v42 = vpop.xlane.xlu0 %2806 }
 0x287   : > { %7262 = vpow2.f32 %v2834_v40  ;;  %v2827_v43 = vsub.f32 %v2794_v51, %v2807_v42 }
 0x289   : > { %v2836_v44 = vmul.f32 1.442695, %v2827_v43 }
 0x28a   : > { %v2810_v45 = vpop.xlane.xlu1 %2809 }
 0x28b   : > { %7264 = vpow2.f32 %v2836_v44  ;;  %v2828_v46 = vsub.f32 %v2795_v63, %v2810_v45 }
 0x28d   : > { %v2838_v13 = vmul.f32 1.442695, %v2828_v46  ;;  %v3283_v46 = vld [vmem:[%s7519_s30] sm:$0x3] }
 0x28e   : > { %v2813_v14 = vpop.xlane.xlu1 %2812 }
 0x28f   : > { %7266 = vpow2.f32 %v2838_v13  ;;  %v2829_v49 = vsub.f32 %v2796_v1, %v2813_v14 }
 0x291   : > { %v2840_v50 = vmul.f32 1.442695, %v2829_v49  ;;  %v3296_v49 = vsel %vm3294_vm6, %v3283_v46, 0 }
 0x292   : > { %v2816_v52 = vpop.xlane.xlu0 %2815 }
 0x293   : > { %7268 = vpow2.f32 %v2840_v50  ;;  %v2819_v54 = vpop.xlane.xlu1 %2818  ;;  %v2830_v55 = vsub.f32 %v2797_v61, %v2816_v52 }
 0x294   : > { %v7263_v56 = vpop.eup %7262  ;;  %v2831_v57 = vsub.f32 %v2798_v16, %v2819_v54  ;;  %v3285_v54 = vld [vmem:[%s7519_s30 + $0x4] sm:$0x3] }
 0x295   : > { %v2842_v48 = vmul.f32 1.442695, %v2830_v55  ;;  %v2850_v53 = vsel %vm2801_vm5, %v7263_v56, 0.0 }
 0x296   : > { %v2844_v58 = vmul.f32 1.442695, %v2831_v57  ;;  %2851 = vadd.xlane.f32.xlu0 %v2850_v53  ;;  %v3388_v57 = vsel %vm3294_vm6, %v3285_v54, 0  ;;  %v3286_v53 = vld [vmem:[%s7519_s30 + $0x6] sm:$0x3] }
 0x297   : > { %7270 = vpow2.f32 %v2842_v48 }
 0x298   : > { %v7265_v51 = vpop.eup %7264  ;;  %7272 = vpow2.f32 %v2844_v58 }
 0x299   : > { %v2853_v59 = vsel %vm2801_vm5, %v7265_v51, 0.0 }
 0x29a   : > { %2854 = vadd.xlane.f32.xlu1 %v2853_v59  ;;  %v2822_v62 = vpop.xlane.xlu0 %2821 }
 0x29b   : > { %v2825_v63 = vpop.xlane.xlu1 %2824  ;;  %v2832_v0 = vsub.f32 %v2799_v28, %v2822_v62  ;;  %v3434_v62 = vsel %vm3294_vm6, %v3286_v53, 0 }
 0x29c   : > { %v7267_v1 = vpop.eup %7266  ;;  %v2833_v3 = vsub.f32 %v2800_v30, %v2825_v63 }
 0x29d   : > { %v2846_v4 = vmul.f32 1.442695, %v2832_v0  ;;  %v2856_v7 = vsel %vm2801_vm5, %v7267_v1, 0.0 }
 0x29e   : > { %v2848_v8 = vmul.f32 1.442695, %v2833_v3  ;;  %2857 = vadd.xlane.f32.xlu0 %v2856_v7 }
 0x29f   : > { %7274 = vpow2.f32 %v2846_v4 }
 0x2a0   : > { %v7269_v60 = vpop.eup %7268  ;;  %7276 = vpow2.f32 %v2848_v8 }
 0x2a1   : > { %v2859_v9 = vsel %vm2801_vm5, %v7269_v60, 0.0 }
 0x2a2   : > { %2860 = vadd.xlane.f32.xlu1 %v2859_v9 }
 0x2a4   : > { %v7271_v11 = vpop.eup %7270 }
 0x2a5   : > { %v7273_v12 = vpop.eup %7272  ;;  %v2862_v15 = vsel %vm2801_vm5, %v7271_v11, 0.0 }
 0x2a6   : > { %v2865_v61 = vsel %vm2801_vm5, %v7273_v12, 0.0  ;;  %2863 = vadd.xlane.f32.xlu0 %v2862_v15 }
 0x2a7   : > { %2866 = vadd.xlane.f32.xlu1 %v2865_v61 }
 0x2ac   : > { %v7886_v16 = vpop.eup %7274 }
 0x2ad   : > { %v7888_v17 = vpop.eup %7276  ;;  %v2868_v18 = vsel %vm2801_vm5, %v7886_v16, 0.0 }
 0x2ae   : > { %v2871_v20 = vsel %vm2801_vm5, %v7888_v17, 0.0  ;;  %2869 = vadd.xlane.f32.xlu0 %v2868_v18 }
 0x2af   : > { %2872 = vadd.xlane.f32.xlu1 %v2871_v20  ;;  %v3289_v20 = vld [vmem:[%s7519_s30 + $0xc] sm:$0x3] }
 0x31f   : > { %v2852_v21 = vpop.xlane.xlu0 %2851 }
 0x320   : > { %7278 = vrcp.f32 %v2852_v21 }
 0x323   : > { %v2855_v22 = vpop.xlane.xlu1 %2854 }
 0x324   : > { %7280 = vrcp.f32 %v2855_v22 }
 0x327   : > { %v2858_v23 = vpop.xlane.xlu0 %2857 }
 0x328   : > { %7282 = vrcp.f32 %v2858_v23 }
 0x32b   : > { %v2861_v24 = vpop.xlane.xlu1 %2860 }
 0x32c   : > { %7284 = vrcp.f32 %v2861_v24  ;;  %v3572_v24 = vsel %vm3294_vm6, %v3289_v20, 0 }
 0x32d   : > { %v7279_v25 = vpop.eup %7278 }
 0x32e   : > { %v2882_v26 = vmul.f32 %v7279_v25, %v7263_v56 }
 0x32f   : > { %v2864_v28 = vpop.xlane.xlu0 %2863 }
 0x330   : > { %v2867_v29 = vpop.xlane.xlu1 %2866  ;;  %7286 = vrcp.f32 %v2864_v28  ;;  %v2890_v30 = vpack.c.bf16 %v2882_v26, %v2882_v26  ;;  %v3290_v28 = vld [vmem:[%s7519_s30 + $0xe] sm:$0x3] }
 0x331   : > { %v7281_v5 = vpop.eup %7280  ;;  %7288 = vrcp.f32 %v2867_v29 }
 0x332   : > { %6937 = vmatmul.mubr.msk.bf16.vlgmr.msra.gmra.mxu0 %vm2801_vm5, %v2890_v30  ;;  %v2883_v31 = vmul.f32 %v7281_v5, %v7265_v51 }
 0x333   : > { %6947 = vmatpush3.bf16.msra.mxu0 %v7851_v10  ;;  %6948 = vmatprep.mubr.msk.bf16.mxu0 %vm7340_vm1, %v7339_v2 }
 0x334   : > { %v2891_v32 = vpack.c.bf16 %v2883_v31, %v2883_v31  ;;  %6958 = vmatprep.subr.bf16.mxu0 %v7339_v2  ;;  %v3618_v31 = vsel %vm3294_vm6, %v3290_v28, 0 }
 0x335   : > { %v7283_v33 = vpop.eup %7282 }
 0x336   : > { %6943 = vmatmul.mubr.msk.bf16.vlgmr.msra.gmra.mxu1 %vm2801_vm5, %v2891_v32  ;;  %v2884_v35 = vmul.f32 %v7283_v33, %v7267_v1  ;;  %v3287_v1 = vld [vmem:[%s7519_s30 + $0x8] sm:$0x3] }
 0x337   : > { %6953 = vmatpush3.bf16.msra.mxu1 %v7855_v19  ;;  %v2870_v36 = vpop.xlane.xlu0 %2869  ;;  %6954 = vmatprep.mubr.msk.bf16.mxu1 %vm7340_vm1, %v7339_v2  ;;  %v3480_v8 = vsel %vm3294_vm6, %v3287_v1, 0 }
 0x338   : > { %v2873_v37 = vpop.xlane.xlu1 %2872  ;;  %7290 = vrcp.f32 %v2870_v36  ;;  %v2892_v6 = vpack.c.bf16 %v2884_v35, %v2884_v35  ;;  %6964 = vmatprep.subr.bf16.mxu1 %v7339_v2 }
 0x339   : > { %v7285_v10 = vpop.eup %7284  ;;  %7292 = vrcp.f32 %v2873_v37 }
 0x33a   : > { %6949 = vmatmul.mubr.msk.bf16.vlgmr.msra.gmra.mxu0 %vm2801_vm5, %v2892_v6  ;;  %v2885_v38 = vmul.f32 %v7285_v10, %v7269_v60 }
 0x33b   : > { %6959 = vmatpush3.bf16.msra.mxu0 %v7859_v27  ;;  %6960 = vmatprep.mubr.msk.bf16.mxu0 %vm7340_vm1, %v7339_v2 }
 0x33c   : > { %v2893_v19 = vpack.c.bf16 %v2885_v38, %v2885_v38  ;;  %6970 = vmatprep.subr.bf16.mxu0 %v7339_v2 }
 0x33d   : > { %v7287_v39 = vpop.eup %7286 }
 0x33e   : > { %v7289_v40 = vpop.eup %7288  ;;  %6955 = vmatmul.mubr.msk.bf16.vlgmr.msra.gmra.mxu1 %vm2801_vm5, %v2893_v19  ;;  %v2886_v42 = vmul.f32 %v7287_v39, %v7271_v11  ;;  %v3288_v11 = vld [vmem:[%s7519_s30 + $0xa] sm:$0x3] }
 0x33f   : > { %6965 = vmatpush3.bf16.msra.mxu1 %v7863_v34  ;;  %6966 = vmatprep.mubr.msk.bf16.mxu1 %vm7340_vm1, %v7339_v2  ;;  %v2887_v27 = vmul.f32 %v7289_v40, %v7273_v12 }
 0x340   : > { %v2894_v43 = vpack.c.bf16 %v2886_v42, %v2886_v42  ;;  %6976 = vmatprep.subr.bf16.mxu1 %v7339_v2 }
 0x341   : > { %v2895_v44 = vpack.c.bf16 %v2887_v27, %v2887_v27 }
 0x342   : > { %6961 = vmatmul.mubr.msk.bf16.vlgmr.msra.gmra.mxu0 %vm2801_vm5, %v2894_v43 }
 0x343   : > { %6971 = vmatpush3.bf16.msra.mxu0 %v7867_v41  ;;  %6972 = vmatprep.mubr.msk.bf16.mxu0 %vm7340_vm1, %v7339_v2 }
 0x344   : > { %6982 = vmatprep.subr.bf16.mxu0 %v7339_v2 }
 0x345   : > { %v7291_v45 = vpop.eup %7290 }
 0x346   : > { %v7293_v34 = vpop.eup %7292  ;;  %6967 = vmatmul.mubr.msk.bf16.vlgmr.msra.gmra.mxu1 %vm2801_vm5, %v2895_v44  ;;  %v2888_v13 = vmul.f32 %v7291_v45, %v7886_v16  ;;  %v3526_v16 = vsel %vm3294_vm6, %v3288_v11, 0 }
 0x347   : > { %6977 = vmatpush3.bf16.msra.mxu1 %v7870_v47  ;;  %6978 = vmatprep.mubr.msk.bf16.mxu1 %vm7340_vm1, %v7339_v2  ;;  %v2889_v14 = vmul.f32 %v7293_v34, %v7888_v17  ;;  %v3284_v47 = vld [vmem:[%s7519_s30 + $0x2] sm:$0x3] }
 0x348   : > { %v2896_v41 = vpack.c.bf16 %v2888_v13, %v2888_v13  ;;  %6988 = vmatprep.subr.bf16.mxu1 %v7339_v2  ;;  %v3342_v52 = vsel %vm3294_vm6, %v3284_v47, 0 }
 0x349   : > { %v2897_v50 = vpack.c.bf16 %v2889_v14, %v2889_v14 }
 0x34a   : > { %6973 = vmatmul.mubr.msk.bf16.vlgmr.msra.gmra.mxu0 %vm2801_vm5, %v2896_v41 }
 0x34b   : > { %6983 = vmatpush3.bf16.msra.mxu0 %v3296_v49  ;;  %6984 = vmatprep.mubr.msk.bf16.mxu0 %vm7340_vm1, %v7339_v2 }
 0x34c   : > { %6994 = vmatprep.subr.bf16.mxu0 %v7339_v2 }
 0x34e   : > { %6979 = vmatmul.mubr.msk.bf16.vlgmr.msra.gmra.mxu1 %vm2801_vm5, %v2897_v50 }
 0x34f   : > { %6990 = vmatprep.mubr.msk.bf16.mxu1 %vm7340_vm1, %v7339_v2  ;;  %6989 = vmatpush3.bf16.msra.mxu1 %v3342_v52 }
 0x350   : > { %7000 = vmatprep.subr.bf16.mxu1 %v7339_v2 }
 0x3f2   : > { %v2947_v55 = vpop.f32.mrf.mxu0 }
 0x3f3   : > { %v3275_v56 = vpack.c.bf16 %v2947_v55, %v2947_v55 }
 0x3f4   : > { %v6938_v48 = vpop.f32.mrf.mxu0 }
 0x3f5   : > { %6985 = vmatmul.mubr.msk.bf16.vlgmr.msra.gmra.mxu0 %vm2424_vm3, %v3275_v56 }
 0x3f6   : > { %v2950_v58 = vpop.f32.mrf.mxu0  ;;  %v2993_v51 = vpop.f32.mrf.mxu1  ;;  %6995 = vmatpush3.bf16.msra.mxu0 %v3388_v57  ;;  %6996 = vmatprep.mubr.msk.bf16.mxu0 %vm7340_vm1, %v7339_v2 }
 0x3f7   : > { %v3276_v59 = vpack.c.bf16 %v2993_v51, %v2993_v51  ;;  %7006 = vmatprep.subr.bf16.mxu0 %v7339_v2 }
 0x3f8   : > { %v6939_v63 = vpop.f32.mrf.mxu0  ;;  %v6944_v0 = vpop.f32.mrf.mxu1 }
 0x3f9   : > { %6991 = vmatmul.mubr.msk.bf16.vlgmr.msra.gmra.mxu1 %vm2424_vm3, %v3276_v59 }
 0x3fa   : > { %v2996_v3 = vpop.f32.mrf.mxu1  ;;  %v3039_v4 = vpop.f32.mrf.mxu0  ;;  %7001 = vmatpush3.bf16.msra.mxu1 %v3434_v62  ;;  %7002 = vmatprep.mubr.msk.bf16.mxu1 %vm7340_vm1, %v7339_v2 }
 0x3fb   : > { %v3277_v7 = vpack.c.bf16 %v3039_v4, %v3039_v4  ;;  %7012 = vmatprep.subr.bf16.mxu1 %v7339_v2 }
 0x3fc   : > { %v6945_v60 = vpop.f32.mrf.mxu1  ;;  %v6950_v9 = vpop.f32.mrf.mxu0 }
 0x3fd   : > { %6997 = vmatmul.mubr.msk.bf16.vlgmr.msra.gmra.mxu0 %vm2424_vm3, %v3277_v7 }
 0x3fe   : > { %v3042_v12 = vpop.f32.mrf.mxu0  ;;  %v3085_v15 = vpop.f32.mrf.mxu1  ;;  %7007 = vmatpush3.bf16.msra.mxu0 %v3480_v8  ;;  %7008 = vmatprep.mubr.msk.bf16.mxu0 %vm7340_vm1, %v7339_v2 }
 0x3ff   : > { %v3278_v61 = vpack.c.bf16 %v3085_v15, %v3085_v15  ;;  %7018 = vmatprep.subr.bf16.mxu0 %v7339_v2 }
 0x400   : > { %v6951_v17 = vpop.f32.mrf.mxu0  ;;  %v6956_v18 = vpop.f32.mrf.mxu1 }
 0x401   : > { %7003 = vmatmul.mubr.msk.bf16.vlgmr.msra.gmra.mxu1 %vm2424_vm3, %v3278_v61 }
 0x402   : > { %v3088_v21 = vpop.f32.mrf.mxu1  ;;  %v3131_v22 = vpop.f32.mrf.mxu0  ;;  %7013 = vmatpush3.bf16.msra.mxu1 %v3526_v16  ;;  %7014 = vmatprep.mubr.msk.bf16.mxu1 %vm7340_vm1, %v7339_v2 }
 0x403   : > { %v3279_v23 = vpack.c.bf16 %v3131_v22, %v3131_v22  ;;  %7024 = vmatprep.subr.bf16.mxu1 %v7339_v2 }
 0x404   : > { %v6957_v25 = vpop.f32.mrf.mxu1  ;;  %v6962_v26 = vpop.f32.mrf.mxu0 }
 0x405   : > { %7009 = vmatmul.mubr.msk.bf16.vlgmr.msra.gmra.mxu0 %vm2424_vm3, %v3279_v23 }
 0x406   : > { %v3134_v29 = vpop.f32.mrf.mxu0  ;;  %v3177_v30 = vpop.f32.mrf.mxu1  ;;  %7019 = vmatpush3.bf16.msra.mxu0 %v3572_v24  ;;  %7020 = vmatprep.mubr.msk.bf16.mxu0 %vm7340_vm1, %v7339_v2  ;;  %v6208_v24 = vld [vmem:[%s8400_s20] ss:$0 sm:$0xff] }
 0x407   : > { %v3280_v5 = vpack.c.bf16 %v3177_v30, %v3177_v30 }
 0x408   : > { %v6963_v32 = vpop.f32.mrf.mxu0  ;;  %v6968_v33 = vpop.f32.mrf.mxu1 }
 0x409   : > { %7015 = vmatmul.mubr.msk.bf16.vlgmr.msra.gmra.mxu1 %vm2424_vm3, %v3280_v5 }
 0x40a   : > { %v3180_v35 = vpop.f32.mrf.mxu1  ;;  %v3223_v36 = vpop.f32.mrf.mxu0  ;;  %7025 = vmatpush3.bf16.msra.mxu1 %v3618_v31  ;;  %7026 = vmatprep.mubr.msk.bf16.mxu1 %vm7340_vm1, %v7339_v2  ;;  %v7298_v31 = vld [vmem:[#allocation2] sm:$0xff] }
 0x40b   : > { %v3281_v37 = vpack.c.bf16 %v3223_v36, %v3223_v36 }
 0x40c   : > { %v6969_v6 = vpop.f32.mrf.mxu1  ;;  %v6974_v10 = vpop.f32.mrf.mxu0 }
 0x40d   : > { %7021 = vmatmul.mubr.msk.bf16.vlgmr.msra.gmra.mxu0 %vm2424_vm3, %v3281_v37 }
 0x40e   : > { %v3226_v38 = vpop.f32.mrf.mxu0  ;;  %v3269_v19 = vpop.f32.mrf.mxu1 }
 0x40f   : > { %v3282_v39 = vpack.c.bf16 %v3269_v19, %v3269_v19  ;;  %v3731_v38 = vld [vmem:[%s7542_s7 + $0x80] sm:$0xff] }
 0x410   : > { %v6975_v40 = vpop.f32.mrf.mxu0  ;;  %v6980_v42 = vpop.f32.mrf.mxu1  ;;  %v3739_v19 = vld [vmem:[%s7542_s7 + $0xc0] sm:$0xff] }
 0x411   : > { %7027 = vmatmul.mubr.msk.bf16.vlgmr.msra.gmra.mxu1 %vm2424_vm3, %v3282_v39  ;;  %v3732_v39 = vld [vmem:[%s7542_s7 + $0x88] sm:$0xff]  ;;  %v6228_v40 = vcombine.high %v3731_v38, %v3739_v19 }
 0x412   : > { %v3272_v43 = vpop.f32.mrf.mxu1  ;;  %v3740_v42 = vld [vmem:[%s7542_s7 + $0xc8] sm:$0xff] }
 0x413   : > { %v6227_v43 = vcombine.low %v3731_v38, %v3739_v19  ;;  %4006 = vmatprep.subr.bf16.mxu0 %v6228_v40  ;;  %v3721_v19 = vld [vmem:[%s7542_s7 + $0x30] sm:$0xff]  ;;  %v3722_v40 = vld [vmem:[%s7542_s7 + $0x38] sm:$0xff] }
 0x414   : > { %v6981_v27 = vpop.f32.mrf.mxu1 }
 0x415   : > { %v6229_v27 = vcombine.low %v3732_v39, %v3740_v42  ;;  %4007 = vmatpush1.bf16.msra.mxu0 %v6227_v43 }
 0x4b5   : > { %v3332_v44 = vpop.f32.mrf.mxu0 }
 0x4b6   : > { %v3660_v53 = vsel %vm992_vm2, %v3332_v44, 0.0  ;;  %v6230_v44 = vcombine.high %v3732_v39, %v3740_v42  ;;  %v3729_v39 = vld [vmem:[%s7542_s7 + $0x70] sm:$0xff]  ;;  %v3730_v42 = vld [vmem:[%s7542_s7 + $0x78] sm:$0xff] }
 0x4b7   : > { %v6986_v45 = vpop.f32.mrf.mxu0 }
 0x4b8   : > { %4047 = vmatprep.subr.bf16.mxu1 %v6230_v44  ;;  %v3715_v45 = vld [vmem:[%s7542_s7] sm:$0xff]  ;;  %v6224_v44 = vcombine.high %v3721_v19, %v3729_v39 }
 0x4b9   : > { %v3335_v46 = vpop.f32.mrf.mxu0  ;;  %v3378_v34 = vpop.f32.mrf.mxu1  ;;  %4048 = vmatpush1.bf16.msra.mxu1 %v6229_v27 }
 0x4ba   : > { %v3661_v56 = vsel %vm992_vm2, %v3378_v34, 0.0  ;;  %v3723_v46 = vld [vmem:[%s7542_s7 + $0x40] sm:$0xff]  ;;  %v3716_v34 = vld [vmem:[%s7542_s7 + $0x8] sm:$0xff] }
 0x4bb   : > { %v6987_v13 = vpop.f32.mrf.mxu0  ;;  %v6992_v2 = vpop.f32.mrf.mxu1  ;;  %v3662_v51 = vadd.f32 %v3661_v56, %v3660_v53  ;;  %v3742_v56 = vld [vmem:[%s7542_s7 + $0xd8] sm:$0xff] }
 0x4bc   : > { %v6212_v13 = vcombine.high %v3715_v45, %v3723_v46  ;;  %v3724_v2 = vld [vmem:[%s7542_s7 + $0x48] sm:$0xff] }
 0x4bd   : > { %v3381_v41 = vpop.f32.mrf.mxu1  ;;  %v3424_v14 = vpop.f32.mrf.mxu0 }
 0x4be   : > { %v3663_v58 = vsel %vm992_vm2, %v3424_v14, 0.0  ;;  %v6211_v41 = vcombine.low %v3715_v45, %v3723_v46  ;;  %v6213_v14 = vcombine.low %v3716_v34, %v3724_v2  ;;  %4008 = vmatprep.subr.bf16.mxu0 %v6212_v13  ;;  %v6226_v45 = vcombine.high %v3722_v40, %v3730_v42  ;;  %v7134_v13 = vld [vmem:[%s7548_s17 + $0x78] sm:$0xff]  }
 0x4bf   : > { %v6993_v49 = vpop.f32.mrf.mxu1  ;;  %v6998_v50 = vpop.f32.mrf.mxu0  ;;  %v3664_v0 = vadd.f32 %v3663_v58, %v3662_v51  ;;  %v6223_v46 = vcombine.low %v3721_v19, %v3729_v39 }
 0x4c0   : > { %v6214_v49 = vcombine.high %v3716_v34, %v3724_v2  ;;  %4009 = vmatpush1.bf16.msra.mxu0 %v6211_v41  ;;  %v3733_v50 = vld [vmem:[%s7542_s7 + $0x90] sm:$0xff]  ;;  %v6225_v34 = vcombine.low %v3722_v40, %v3730_v42  ;;  %v7135_v2 = vld [vmem:[%s7548_s17 + $0xf8] sm:$0xff]  }
 0x4c1   : > { %v3427_v47 = vpop.f32.mrf.mxu0  ;;  %v3470_v52 = vpop.f32.mrf.mxu1  ;;  %v7136_v41 = vld [vmem:[%s7548_s17 + $0x38] sm:$0xff]  }
 0x4c2   : > { %v3665_v63 = vsel %vm992_vm2, %v3470_v52, 0.0  ;;  %4049 = vmatprep.subr.bf16.mxu1 %v6214_v49  ;;  %v3741_v47 = vld [vmem:[%s7542_s7 + $0xd0] sm:$0xff]  ;;  %v3734_v52 = vld [vmem:[%s7542_s7 + $0x98] sm:$0xff] }
 0x4c3   : > { %v6999_v54 = vpop.f32.mrf.mxu0  ;;  %v7004_v55 = vpop.f32.mrf.mxu1  ;;  %v3666_v7 = vadd.f32 %v3665_v63, %v3664_v0  ;;  %4050 = vmatpush1.bf16.msra.mxu1 %v6213_v14  ;;  %v6234_v53 = vcombine.high %v3734_v52, %v3742_v56  ;;  %v6209_v63 = vld [vmem:[%s8401_s3] ss:$0 sm:$0xff]  ;;  %v7137_v14 = vld [vmem:[%s7548_s17 + $0xb8] sm:$0xff]   ;;  %v7138_v49 = vld [vmem:[%s7548_s17 + $0x70] sm:$0xff]   ;;  %s8407_s3 = sld [smem:[#allocation26_spill]] (!%p6382_p8) }
 0x4c4   : > { %v7341_v54 = vmov 0   ;;  %v6232_v55 = vcombine.high %v3733_v50, %v3741_v47 }
 0x4c5   : > { %v3473_v57 = vpop.f32.mrf.mxu1  ;;  %v3516_v48 = vpop.f32.mrf.mxu0  ;;  %4026 = vmatprep.mubr.bf16.mxu0 %v7341_v54  ;;  %4067 = vmatprep.mubr.bf16.mxu1 %v7341_v54 }
 0x4c6   : > { %v3667_v4 = vsel %vm992_vm2, %v3516_v48, 0.0  ;;  %v6231_v57 = vcombine.low %v3733_v50, %v3741_v47  ;;  %v6233_v48 = vcombine.low %v3734_v52, %v3742_v56  ;;  %4088 = vmatprep.subr.bf16.mxu0 %v6232_v55  ;;  %4129 = vmatprep.subr.bf16.mxu1 %v6234_v53  ;;  %v7139_v50 = vld [vmem:[%s7548_s17 + $0xf0] sm:$0xff]   ;;  %v7143_v55 = vld [vmem:[%s7548_s17 + $0xe8] sm:$0xff]   ;;  %v7147_v53 = vld [vmem:[%s7548_s17 + $0xe0] sm:$0xff]  }
 0x4c7   : > { %v7005_v59 = vpop.f32.mrf.mxu1  ;;  %v7010_v62 = vpop.f32.mrf.mxu0  ;;  %v3668_v11 = vadd.f32 %v3667_v4, %v3666_v7  ;;  %v3717_v4 = vld [vmem:[%s7542_s7 + $0x10] sm:$0xff]  ;;  %v7144_v56 = vld [vmem:[%s7548_s17 + $0x28] sm:$0xff]  }
 0x4c8   : > { %v3725_v7 = vld [vmem:[%s7542_s7 + $0x50] sm:$0xff] }
 0x4c9   : > { %v3519_v1 = vpop.f32.mrf.mxu0  ;;  %v3562_v3 = vpop.f32.mrf.mxu1  ;;  %v7140_v47 = vld [vmem:[%s7548_s17 + $0x30] sm:$0xff]  }
 0x4ca   : > { %v3669_v9 = vsel %vm992_vm2, %v3562_v3, 0.0  ;;  %v6210_v1 = vld [vmem:[%s8402_s5] ss:$0 sm:$0xff]  ;;  %v7141_v52 = vld [vmem:[%s7548_s17 + $0xb0] sm:$0xff]  }
 0x4cb   : > { %v7011_v8 = vpop.f32.mrf.mxu0  ;;  %v7016_v60 = vpop.f32.mrf.mxu1  ;;  %v3670_v16 = vadd.f32 %v3669_v9, %v3668_v11 }
 0x4cc   : > { %v3718_v8 = vld [vmem:[%s7542_s7 + $0x18] sm:$0xff] }
 0x4cd   : > { %v3565_v12 = vpop.f32.mrf.mxu1  ;;  %v3608_v15 = vpop.f32.mrf.mxu0  ;;  %v3726_v60 = vld [vmem:[%s7542_s7 + $0x58] sm:$0xff] }
 0x4ce   : > { %v3671_v61 = vsel %vm992_vm2, %v3608_v15, 0.0  ;;  %v6216_v12 = vcombine.high %v3717_v4, %v3725_v7  ;;  %v6218_v15 = vcombine.high %v3718_v8, %v3726_v60 }
 0x4cf   : > { %v7017_v17 = vpop.f32.mrf.mxu1  ;;  %v7022_v18 = vpop.f32.mrf.mxu0  ;;  %v3672_v20 = vadd.f32 %v3671_v61, %v3670_v16  ;;  %v3735_v61 = vld [vmem:[%s7542_s7 + $0xa0] sm:$0xff] }
 0x4d0   : > { %v3743_v16 = vld [vmem:[%s7542_s7 + $0xe0] sm:$0xff]  ;;  %v3736_v17 = vld [vmem:[%s7542_s7 + $0xa8] sm:$0xff] }
 0x4d1   : > { %v3611_v21 = vpop.f32.mrf.mxu0  ;;  %v3654_v22 = vpop.f32.mrf.mxu1  ;;  %v3744_v18 = vld [vmem:[%s7542_s7 + $0xe8] sm:$0xff] }
 0x4d2   : > { %v3673_v23 = vsel %vm992_vm2, %v3654_v22, 0.0  ;;  %v6217_v21 = vcombine.low %v3718_v8, %v3726_v60  ;;  %v6236_v22 = vcombine.high %v3735_v61, %v3743_v16  ;;  %v7158_v8 = vld [vmem:[%s7548_s17 + $0x48] sm:$0xff]  }
 0x4d3   : > { %v3674_v25 = vadd.f32 %v3673_v23, %v3672_v20  ;;  %v7023_v26 = vpop.f32.mrf.mxu0  ;;  %v7028_v28 = vpop.f32.mrf.mxu1  ;;  %v6215_v20 = vcombine.low %v3717_v4, %v3725_v7  ;;  %v6238_v23 = vcombine.high %v3736_v17, %v3744_v18  ;;  %v7156_v4 = vld [vmem:[%s7548_s17 + $0x10] sm:$0xff]   ;;  %v7159_v60 = vld [vmem:[%s7548_s17 + $0xc8] sm:$0xff]  }
 0x4d4   : > { %v3720_v26 = vld [vmem:[%s7542_s7 + $0x28] sm:$0xff]  ;;  %v7157_v7 = vld [vmem:[%s7548_s17 + $0x90] sm:$0xff]  }
 0x4d5   : > { %v3682_v29 = vadd.f32 %v6208_v24, %v3674_v25  ;;  %v3657_v30 = vpop.f32.mrf.mxu1  ;;  %v3719_v24 = vld [vmem:[%s7542_s7 + $0x20] sm:$0xff]  ;;  %v3728_v28 = vld [vmem:[%s7542_s7 + $0x68] sm:$0xff] }
 0x4d6   : > { %v3727_v25 = vld [vmem:[%s7542_s7 + $0x60] sm:$0xff]  ;;  %v6237_v30 = vcombine.low %v3736_v17, %v3744_v18  ;;  %v7166_v18 = vld [vmem:[%s7548_s17 + $0x178] sm:$0xff]  }
 0x4d7   : > { %v7029_v5 = vpop.f32.mrf.mxu1  ;;  %v3683_v32 = vadd.f32 %v7298_v31, %v3682_v29  ;;  %v6235_v29 = vcombine.low %v3735_v61, %v3743_v16  ;;  %v6222_v31 = vcombine.high %v3720_v26, %v3728_v28  ;;  %v7163_v61 = vld [vmem:[%s7548_s17 + $0xc0] sm:$0xff]  }
 0x4d8   : > { %v6220_v5 = vcombine.high %v3719_v24, %v3727_v25  ;;  %v7164_v16 = vld [vmem:[%s7548_s17] sm:$0xff]  }
 0x4d9   : > { %v3686_v33 = vsel %vm992_vm2, %v3683_v32, 0.0  ;;  %v7165_v17 = vld [vmem:[%s7548_s17 + $0x80] sm:$0xff]  }
 0x4da   : > { %3687 = vadd.xlane.f32.xlu0 %v3686_v33  ;;  %v3745_v33 = vld [vmem:[%s7542_s7 + $0xf0] sm:$0xff] }
 0x563   : > { %v3688_v35 = vpop.xlane.xlu0 %3687 }
 0x564   : > { %v3690_v36 = vmul.f32 0.03125, %v3688_v35  ;;  %v3738_v35 = vld [vmem:[%s7542_s7 + $0xb8] sm:$0xff] }
 0x566   : > { %v3691_v37 = vsub.f32 %v3683_v32, %v3690_v36  ;;  %v3737_v32 = vld [vmem:[%s7542_s7 + $0xb0] sm:$0xff]  ;;  %v3746_v36 = vld [vmem:[%s7542_s7 + $0xf8] sm:$0xff]  ;;  %s8403_s7 = sld [smem:[#allocation13_spill]] }
 0x567   : > { %v6242_v38 = vcombine.high %v3738_v35, %v3746_v36  ;;  %v6239_v43 = vcombine.low %v3737_v32, %v3745_v33  ;;  %v6241_v27 = vcombine.low %v3738_v35, %v3746_v36 }
 0x568   : > { %v3692_v6 = vmul.f32 %v3691_v37, %v3691_v37 }
 0x56a   : > { %v3693_v10 = vsel %vm992_vm2, %v3692_v6, 0.0  ;;  %v6221_v6 = vcombine.low %v3720_v26, %v3728_v28 }
 0x56b   : > { %3694 = vadd.xlane.f32.xlu1 %v3693_v10  ;;  %v6240_v10 = vcombine.high %v3737_v32, %v3745_v33 }
 0x5f4   : > { %v3695_v58 = vpop.xlane.xlu1 %3694 }
 0x5f5   : > { %v3696_v51 = vmul.f32 0.03125, %v3695_v58  ;;  %v7148_v58 = vld [vmem:[%s7548_s17 + $0x20] sm:$0xff]  }
 0x5f7   : > { %v3697_v59 = vadd.f32 1e-05, %v3696_v51  ;;  %v7149_v51 = vld [vmem:[%s7548_s17 + $0xa0] sm:$0xff]  }
 0x5f9   : > { %7294 = vrsqrt.f32 %v3697_v59  ;;  %v7150_v59 = vld [vmem:[%s7548_s17 + $0x58] sm:$0xff]  }
 0x606   : > { %v7295_v62 = vpop.eup %7294 }
 0x607   : > { %v3699_v0 = vmul.f32 %v7295_v62, %v3691_v37  ;;  %v6219_v37 = vcombine.low %v3719_v24, %v3727_v25  ;;  %v7151_v62 = vld [vmem:[%s7548_s17 + $0xd8] sm:$0xff]   ;;  %v8099_v24 = vld [vmem:[%s8403_s7 + $0x8] sm:$0xff] }
 0x609   : > { %v3706_v3 = vmul.f32 %v6209_v63, %v3699_v0  ;;  %v7152_v63 = vld [vmem:[%s7548_s17 + $0x18] sm:$0xff]  }
 0x60a   : > { %v7153_v0 = vld [vmem:[%s7548_s17 + $0x98] sm:$0xff]  }
 0x60b   : > { %v8017_v9 = vadd.f32 %v6210_v1, %v3706_v3  ;;  %v7154_v1 = vld [vmem:[%s7548_s17 + $0x50] sm:$0xff]  }
 0x60c   : > { %v7155_v3 = vld [vmem:[%s7548_s17 + $0xd0] sm:$0xff]  }
 0x60d   : > { %v8021_v11 = vpack.c.bf16 %v8017_v9, %v8017_v9 }
 0x60f   : > { %6243 = vmatmul.mubr.msk.bf16.vlgmr.msra.gmra.mxu0 %vm992_vm2, %v8021_v11  ;;  %6244 = vmatmul.mubr.msk.bf16.vlgmr.msra.gmra.mxu1 %vm992_vm2, %v8021_v11 }
 0x610   : > { %4089 = vmatpush1.bf16.msra.mxu0 %v6231_v57  ;;  %4130 = vmatpush1.bf16.msra.mxu1 %v6233_v48  ;;  %v7145_v57 = vld [vmem:[%s7548_s17 + $0xa8] sm:$0xff]   ;;  %v7146_v48 = vld [vmem:[%s7548_s17 + $0x60] sm:$0xff]  }
 0x611   : > { %4090 = vmatprep.subr.bf16.mxu0 %v6216_v12  ;;  %4131 = vmatprep.subr.bf16.mxu1 %v6218_v15  ;;  %v7161_v12 = vld [vmem:[%s7548_s17 + $0x88] sm:$0xff]   ;;  %v7162_v15 = vld [vmem:[%s7548_s17 + $0x40] sm:$0xff]  }
 0x612   : > { %4108 = vmatprep.mubr.bf16.mxu0 %v7341_v54  ;;  %4149 = vmatprep.mubr.bf16.mxu1 %v7341_v54 }
 0x614   : > { %4091 = vmatpush1.bf16.msra.mxu0 %v6215_v20  ;;  %4132 = vmatpush1.bf16.msra.mxu1 %v6217_v21  ;;  %v7167_v20 = vld [vmem:[%s7548_s17 + $0x1f8] sm:$0xff]   ;;  %v3751_v21 = vlaneseq }
 0x615   : > { %4170 = vmatprep.subr.bf16.mxu0 %v6236_v22  ;;  %4211 = vmatprep.subr.bf16.mxu1 %v6238_v23 }
 0x616   : > { %v8095_v22 = vshrl.u32 %v3751_v21, 7 }
 0x617   : > { %6245 = vmatmul.mubr.msk.bf16.vlgmr.msra.gmra.mxu0 %vm992_vm2, %v8021_v11  ;;  %6246 = vmatmul.mubr.msk.bf16.vlgmr.msra.gmra.mxu1 %vm992_vm2, %v8021_v11 }
 0x618   : > { %4171 = vmatpush1.bf16.msra.mxu0 %v6235_v29  ;;  %4212 = vmatpush1.bf16.msra.mxu1 %v6237_v30  ;;  %v3777_v23 = vsub.s32 6, %v8095_v22  ;;  %v3753_v26 = vsub.s32 0, %v8095_v22  ;;  %v3761_v28 = vsub.s32 2, %v8095_v22  ;;  %v8109_v29 = vld [vmem:[%s8403_s7] sm:$0xff]  ;;  %v3757_v30 = vsub.s32 1, %v8095_v22 }
 0x619   : > { %4172 = vmatprep.subr.bf16.mxu0 %v6220_v5  ;;  %4213 = vmatprep.subr.bf16.mxu1 %v6222_v31  ;;  %v3765_v5 = vsub.s32 3, %v8095_v22  ;;  %v3773_v42 = vsub.s32 5, %v8095_v22 }
 0x61a   : > { %4190 = vmatprep.mubr.bf16.mxu0 %v7341_v54  ;;  %4231 = vmatprep.mubr.bf16.mxu1 %v7341_v54  ;;  %v8104_v25 = vrot.slane %v8099_v24, %v3777_v23  ;;  %v3754_v31 = vrot.slane %v8109_v29, %v3753_v26  ;;  %v3762_v32 = vrot.slane %v8109_v29, %v3761_v28 }
 0x61b   : > { %v3758_v33 = vrot.slane %v8109_v29, %v3757_v30  ;;  %v3766_v35 = vrot.slane %v8109_v29, %v3765_v5 }
 0x61c   : > { %4173 = vmatpush1.bf16.msra.mxu0 %v6219_v37  ;;  %4214 = vmatpush1.bf16.msra.mxu1 %v6221_v6 }
 0x61d   : > { %4252 = vmatprep.subr.bf16.mxu0 %v6240_v10  ;;  %4293 = vmatprep.subr.bf16.mxu1 %v6242_v38 }
 0x61f   : > { %6247 = vmatmul.mubr.msk.bf16.vlgmr.msra.gmra.mxu0 %vm992_vm2, %v8021_v11  ;;  %6248 = vmatmul.mubr.msk.bf16.vlgmr.msra.gmra.mxu1 %vm992_vm2, %v8021_v11 }
 0x620   : > { %4253 = vmatpush1.bf16.msra.mxu0 %v6239_v43  ;;  %4294 = vmatpush1.bf16.msra.mxu1 %v6241_v27  ;;  %v3781_v43 = vsub.s32 7, %v8095_v22 }
 0x621   : > { %4254 = vmatprep.subr.bf16.mxu0 %v6224_v44  ;;  %4295 = vmatprep.subr.bf16.mxu1 %v6226_v45 }
 0x622   : > { %4272 = vmatprep.mubr.bf16.mxu0 %v7341_v54  ;;  %4313 = vmatprep.mubr.bf16.mxu1 %v7341_v54  ;;  %v7142_v54 = vld [vmem:[%s7548_s17 + $0x68] sm:$0xff]  }
 0x624   : > { %4255 = vmatpush1.bf16.msra.mxu0 %v6223_v46  ;;  %4296 = vmatpush1.bf16.msra.mxu1 %v6225_v34 }
 0x625   : > { %6513 = vmatprep.subr.bf16.mxu0 %v7134_v13  ;;  %6535 = vmatprep.subr.bf16.mxu1 %v7135_v2 }
 0x627   : > { %6249 = vmatmul.mubr.msk.bf16.vlgmr.msra.gmra.mxu0 %vm992_vm2, %v8021_v11  ;;  %6250 = vmatmul.mubr.msk.bf16.vlgmr.msra.gmra.mxu1 %vm992_vm2, %v8021_v11  ;;  %v7160_v11 = vld [vmem:[%s7548_s17 + $0x8] sm:$0xff]  }
 0x628   : > { %6514 = vmatpush3.bf16.msra.mxu0 %v7136_v41  ;;  %6536 = vmatpush3.bf16.msra.mxu1 %v7137_v14 }
 0x629   : > { %6515 = vmatprep.subr.bf16.mxu0 %v7138_v49  ;;  %6537 = vmatprep.subr.bf16.mxu1 %v7139_v50  ;;  %v3774_v50 = vrot.slane %v8109_v29, %v3773_v42 }
 0x62c   : > { %6516 = vmatpush3.bf16.msra.mxu0 %v7140_v47  ;;  %6538 = vmatpush3.bf16.msra.mxu1 %v7141_v52  ;;  %v3782_v47 = vrot.slane %v8109_v29, %v3781_v43  ;;  %v7168_v52 = vld [vmem:[%s7548_s17 + $0x138] sm:$0xff]  }
 0x62d   : > { %6517 = vmatprep.subr.bf16.mxu0 %v7142_v54  ;;  %6539 = vmatprep.subr.bf16.mxu1 %v7143_v55  ;;  %v7169_v54 = vld [vmem:[%s7548_s17 + $0x1b8] sm:$0xff]  }
 0x630   : > { %6518 = vmatpush3.bf16.msra.mxu0 %v7144_v56  ;;  %6540 = vmatpush3.bf16.msra.mxu1 %v7145_v57 }
 0x631   : > { %6519 = vmatprep.subr.bf16.mxu0 %v7146_v48  ;;  %6541 = vmatprep.subr.bf16.mxu1 %v7147_v53  ;;  %v7170_v53 = vld [vmem:[%s7548_s17 + $0x170] sm:$0xff]  }
 0x634   : > { %6520 = vmatpush3.bf16.msra.mxu0 %v7148_v58  ;;  %6542 = vmatpush3.bf16.msra.mxu1 %v7149_v51  ;;  %v7171_v58 = vld [vmem:[%s7548_s17 + $0x1f0] sm:$0xff]  }
 0x635   : > { %6521 = vmatprep.subr.bf16.mxu0 %v7150_v59  ;;  %6543 = vmatprep.subr.bf16.mxu1 %v7151_v62 }
 0x638   : > { %6522 = vmatpush3.bf16.msra.mxu0 %v7152_v63  ;;  %6544 = vmatpush3.bf16.msra.mxu1 %v7153_v0  ;;  %v7172_v0 = vld [vmem:[%s7548_s17 + $0x130] sm:$0xff]  }
 0x639   : > { %6523 = vmatprep.subr.bf16.mxu0 %v7154_v1  ;;  %6545 = vmatprep.subr.bf16.mxu1 %v7155_v3  ;;  %v7173_v1 = vld [vmem:[%s7548_s17 + $0x1b0] sm:$0xff]  }
 0x63c   : > { %6524 = vmatpush3.bf16.msra.mxu0 %v7156_v4  ;;  %6546 = vmatpush3.bf16.msra.mxu1 %v7157_v7  ;;  %v7174_v7 = vld [vmem:[%s7548_s17 + $0x168] sm:$0xff]  }
 0x63d   : > { %6525 = vmatprep.subr.bf16.mxu0 %v7158_v8  ;;  %6547 = vmatprep.subr.bf16.mxu1 %v7159_v60  ;;  %v7175_v8 = vld [vmem:[%s7548_s17 + $0x1e8] sm:$0xff]  }
 0x640   : > { %6526 = vmatpush3.bf16.msra.mxu0 %v7160_v11  ;;  %6548 = vmatpush3.bf16.msra.mxu1 %v7161_v12 }
 0x641   : > { %6527 = vmatprep.subr.bf16.mxu0 %v7162_v15  ;;  %6549 = vmatprep.subr.bf16.mxu1 %v7163_v61 }
 0x644   : > { %6528 = vmatpush3.bf16.msra.mxu0 %v7164_v16  ;;  %6550 = vmatpush3.bf16.msra.mxu1 %v7165_v17  ;;  %v7176_v17 = vld [vmem:[%s7548_s17 + $0x128] sm:$0xff]  }
 0x645   : > { %6557 = vmatprep.subr.bf16.mxu0 %v7166_v18  ;;  %6579 = vmatprep.subr.bf16.mxu1 %v7167_v20  ;;  %v7177_v18 = vld [vmem:[%s7548_s17 + $0x1a8] sm:$0xff]  }
 0x6cf   : > { %v4028_v36 = vpop.f32.mrf.mxu0  ;;  %v4069_v37 = vpop.f32.mrf.mxu1 }
 0x6d0   : > { %v4029_v6 = vadd.f32 %v4028_v36, %v3754_v31  ;;  %v4070_v10 = vadd.f32 %v4069_v37, %v3762_v32  ;;  %v7178_v31 = vld [vmem:[%s7548_s17 + $0x160] sm:$0xff]   ;;  %v3769_v36 = vsub.s32 4, %v8095_v22 }
 0x6d1   : > { %v4030_v38 = vpop.f32.mrf.mxu0  ;;  %v4071_v19 = vpop.f32.mrf.mxu1  ;;  %v7179_v32 = vld [vmem:[%s7548_s17 + $0x1e0] sm:$0xff]  }
 0x6d2   : > { %v4031_v39 = vadd.f32 %v4030_v38, %v3758_v33  ;;  %v4072_v40 = vadd.f32 %v4071_v19, %v3766_v35  ;;  %v4322_v27 = vmax.f32 %v4029_v6, 0.0  ;;  %v4324_v44 = vmax.f32 %v4070_v10, 0.0  ;;  %v7180_v37 = vld [vmem:[%s7548_s17 + $0x120] sm:$0xff]   ;;  %v7182_v19 = vld [vmem:[%s7548_s17 + $0x158] sm:$0xff]  }
 0x6d3   : > { %v4032_v45 = vpop.f32.mrf.mxu0  ;;  %v4073_v46 = vpop.f32.mrf.mxu1  ;;  %v7181_v6 = vld [vmem:[%s7548_s17 + $0x1a0] sm:$0xff]  }
 0x6d4   : > { %v4323_v34 = vmax.f32 %v4031_v39, 0.0  ;;  %v4325_v13 = vmax.f32 %v4072_v40, 0.0  ;;  %v4338_v55 = vpack.c.bf16 %v4322_v27, %v4322_v27  ;;  %v4340_v56 = vpack.c.bf16 %v4324_v44, %v4324_v44  ;;  %v7183_v39 = vld [vmem:[%s7548_s17 + $0x1d8] sm:$0xff]  }
 0x6d5   : > { %v4033_v2 = vpop.f32.mrf.mxu0  ;;  %v4074_v41 = vpop.f32.mrf.mxu1  ;;  %v3802_v40 = vrot.slane %v8099_v24, %v3769_v36  ;;  %v7184_v45 = vld [vmem:[%s7548_s17 + $0x118] sm:$0xff]  }
 0x6d6   : > { %v4339_v14 = vpack.c.bf16 %v4323_v34, %v4323_v34  ;;  %v4341_v49 = vpack.c.bf16 %v4325_v13, %v4325_v13  ;;  %v7185_v46 = vld [vmem:[%s7548_s17 + $0x198] sm:$0xff]   ;;  %v7186_v2 = vld [vmem:[%s7548_s17 + $0x150] sm:$0xff]  }
 0x6d7   : > { %v8135_v57 = vpop.f32.mrf.mxu0  ;;  %v8137_v48 = vpop.f32.mrf.mxu1  ;;  %v7187_v41 = vld [vmem:[%s7548_s17 + $0x1d0] sm:$0xff]  }
 0x6d8   : > { %5417 = vmatprep.mubr.bf16.mxu0 %v4339_v14  ;;  %5457 = vmatprep.mubr.bf16.mxu1 %v4341_v49 }
 0x6d9   : > { %v4112_v51 = vpop.f32.mrf.mxu0  ;;  %v4153_v59 = vpop.f32.mrf.mxu1  ;;  %5418 = vmatmul.mubr.bf16.vlgmr.msra.gmra.mxu0 %v4338_v55  ;;  %5458 = vmatmul.mubr.bf16.vlgmr.msra.gmra.mxu1 %v4340_v56  ;;  %v3770_v55 = vrot.slane %v8109_v29, %v3769_v36  ;;  %v3778_v56 = vrot.slane %v8109_v29, %v3777_v23  ;;  %v7192_v23 = vld [vmem:[%s7548_s17 + $0x108] sm:$0xff]  }
 0x6da   : > { %v4113_v62 = vadd.f32 %v4112_v51, %v3774_v50  ;;  %v4154_v63 = vadd.f32 %v4153_v59, %v3782_v47  ;;  %6558 = vmatpush3.bf16.msra.mxu0 %v7168_v52  ;;  %6580 = vmatpush3.bf16.msra.mxu1 %v7169_v54  ;;  %v7188_v52 = vld [vmem:[%s7548_s17 + $0x110] sm:$0xff]   ;;  %v7191_v51 = vld [vmem:[%s7548_s17 + $0x1c8] sm:$0xff]   ;;  %v3790_v59 = vrot.slane %v8099_v24, %v3757_v30  ;;  %v7194_v30 = vld [vmem:[%s7548_s17 + $0x140] sm:$0xff]  }
 0x6db   : > { %v4114_v3 = vpop.f32.mrf.mxu0  ;;  %v4155_v4 = vpop.f32.mrf.mxu1  ;;  %6559 = vmatprep.subr.bf16.mxu0 %v7170_v53  ;;  %6581 = vmatprep.subr.bf16.mxu1 %v7171_v58  ;;  %v7189_v54 = vld [vmem:[%s7548_s17 + $0x190] sm:$0xff]   ;;  %v7193_v29 = vld [vmem:[%s7548_s17 + $0x188] sm:$0xff]  }
 0x6dc   : > { %v4327_v60 = vmax.f32 %v4113_v62, 0.0  ;;  %v4329_v11 = vmax.f32 %v4154_v63, 0.0  ;;  %v3798_v62 = vrot.slane %v8099_v24, %v3765_v5  ;;  %v4152_v3 = vadd.f32 %v8137_v48, %v3778_v56  ;;  %v7195_v4 = vld [vmem:[%s7548_s17 + $0x1c0] sm:$0xff]   ;;  %v7199_v48 = vld [vmem:[%s7548_s17 + $0x2f8] sm:$0xff]   ;;  %v7221_v56 = vld [vmem:[%s7548_s17 + $0x290] sm:$0xff]  }
 0x6dd   : > { %v4115_v12 = vpop.f32.mrf.mxu0  ;;  %v4156_v15 = vpop.f32.mrf.mxu1 }
 0x6de   : > { %v4343_v61 = vpack.c.bf16 %v4327_v60, %v4327_v60  ;;  %v4345_v16 = vpack.c.bf16 %v4329_v11, %v4329_v11  ;;  %6560 = vmatpush3.bf16.msra.mxu0 %v7172_v0  ;;  %6582 = vmatpush3.bf16.msra.mxu1 %v7173_v1  ;;  %v4111_v1 = vadd.f32 %v8135_v57, %v3770_v55  ;;  %v7197_v60 = vld [vmem:[%s7548_s17 + $0x180] sm:$0xff]   ;;  %v4328_v12 = vmax.f32 %v4152_v3, 0.0  ;;  %v7198_v57 = vld [vmem:[%s7548_s17 + $0x278] sm:$0xff]  }
 0x6df   : > { %v8147_v20 = vpop.f32.mrf.mxu0  ;;  %v8149_v21 = vpop.f32.mrf.mxu1  ;;  %6561 = vmatprep.subr.bf16.mxu0 %v7174_v7  ;;  %6583 = vmatprep.subr.bf16.mxu1 %v7175_v8  ;;  %v7196_v8 = vld [vmem:[%s7548_s17 + $0x100] sm:$0xff]   ;;  %v3786_v55 = vrot.slane %v8099_v24, %v3753_v26  ;;  %v3814_v26 = vrot.slane %v8099_v24, %v3781_v43 }
 0x6e0   : > { %5497 = vmatprep.mubr.bf16.mxu0 %v4343_v61  ;;  %5537 = vmatprep.mubr.bf16.mxu1 %v4345_v16  ;;  %v4326_v11 = vmax.f32 %v4111_v1, 0.0  ;;  %v7200_v16 = vld [vmem:[%s7548_s17 + $0x238] sm:$0xff]  }
 0x6e1   : > { %v4194_v33 = vpop.f32.mrf.mxu0  ;;  %v4235_v35 = vpop.f32.mrf.mxu1 }
 0x6e2   : > { %6562 = vmatpush3.bf16.msra.mxu0 %v7176_v17  ;;  %6584 = vmatpush3.bf16.msra.mxu1 %v7177_v18  ;;  %v4195_v7 = vadd.f32 %v4194_v33, %v3790_v59  ;;  %v4236_v5 = vadd.f32 %v4235_v35, %v3798_v62  ;;  %v4342_v17 = vpack.c.bf16 %v4326_v11, %v4326_v11  ;;  %v7202_v33 = vld [vmem:[%s7548_s17 + $0x270] sm:$0xff]   ;;  %v7224_v59 = vld [vmem:[%s7548_s17 + $0x208] sm:$0xff]  }
 0x6e3   : > { %v4196_v10 = vpop.f32.mrf.mxu0  ;;  %v4237_v38 = vpop.f32.mrf.mxu1  ;;  %6563 = vmatprep.subr.bf16.mxu0 %v7178_v31  ;;  %6585 = vmatprep.subr.bf16.mxu1 %v7179_v32  ;;  %v4344_v18 = vpack.c.bf16 %v4328_v12, %v4328_v12  ;;  %v7201_v31 = vld [vmem:[%s7548_s17 + $0x2b8] sm:$0xff]   ;;  %v7203_v35 = vld [vmem:[%s7548_s17 + $0x2f0] sm:$0xff]   ;;  %v4193_v62 = vadd.f32 %v8147_v20, %v3786_v55  ;;  %v7229_v20 = vld [vmem:[%s7548_s17 + $0x280] sm:$0xff]  }
 0x6e4   : > { %v4331_v15 = vmax.f32 %v4195_v7, 0.0  ;;  %v4333_v61 = vmax.f32 %v4236_v5, 0.0  ;;  %v7206_v10 = vld [vmem:[%s7548_s17 + $0x268] sm:$0xff]   ;;  %v7234_v5 = vld [vmem:[%s7548_s17 + $0x370] sm:$0xff]  }
 0x6e5   : > { %v4197_v27 = vpop.f32.mrf.mxu0  ;;  %v4238_v44 = vpop.f32.mrf.mxu1  ;;  %v7207_v38 = vld [vmem:[%s7548_s17 + $0x2e8] sm:$0xff]   ;;  %v4330_v43 = vmax.f32 %v4193_v62, 0.0  ;;  %v7236_v12 = vld [vmem:[%s7548_s17 + $0x330] sm:$0xff]  }
 0x6e6   : > { %6564 = vmatpush3.bf16.msra.mxu0 %v7180_v37  ;;  %6586 = vmatpush3.bf16.msra.mxu1 %v7181_v6  ;;  %v4347_v32 = vpack.c.bf16 %v4331_v15, %v4331_v15  ;;  %v4349_v36 = vpack.c.bf16 %v4333_v61, %v4333_v61  ;;  %v7204_v37 = vld [vmem:[%s7548_s17 + $0x230] sm:$0xff]   ;;  %v7211_v27 = vld [vmem:[%s7548_s17 + $0x2e0] sm:$0xff]   ;;  %v7239_v15 = vld [vmem:[%s7548_s17 + $0x3e8] sm:$0xff]  }
 0x6e7   : > { %v4274_v34 = vpop.f32.mrf.mxu0  ;;  %v4315_v13 = vpop.f32.mrf.mxu1  ;;  %6565 = vmatprep.subr.bf16.mxu0 %v7182_v19  ;;  %6587 = vmatprep.subr.bf16.mxu1 %v7183_v39  ;;  %v7205_v6 = vld [vmem:[%s7548_s17 + $0x2b0] sm:$0xff]   ;;  %v7208_v19 = vld [vmem:[%s7548_s17 + $0x228] sm:$0xff]   ;;  %v7212_v44 = vld [vmem:[%s7548_s17 + $0x220] sm:$0xff]  }
 0x6e8   : > { %v8163_v14 = vadd.f32 %v4274_v34, %v3802_v40  ;;  %v8166_v49 = vadd.f32 %v4315_v13, %v8104_v25  ;;  %v7190_v25 = vld [vmem:[%s7548_s17 + $0x148] sm:$0xff]   ;;  %v7210_v40 = vld [vmem:[%s7548_s17 + $0x260] sm:$0xff]   ;;  %v7215_v34 = vld [vmem:[%s7548_s17 + $0x2d8] sm:$0xff]  }
 0x6e9   : > { %v8168_v50 = vpop.f32.mrf.mxu0  ;;  %v8170_v47 = vpop.f32.mrf.mxu1  ;;  %v7209_v39 = vld [vmem:[%s7548_s17 + $0x2a8] sm:$0xff]   ;;  %v7216_v13 = vld [vmem:[%s7548_s17 + $0x218] sm:$0xff]  }
 0x6ea   : > { %6566 = vmatpush3.bf16.msra.mxu0 %v7184_v45  ;;  %6588 = vmatpush3.bf16.msra.mxu1 %v7185_v46  ;;  %v7213_v45 = vld [vmem:[%s7548_s17 + $0x2a0] sm:$0xff]   ;;  %v7214_v46 = vld [vmem:[%s7548_s17 + $0x258] sm:$0xff]   ;;  %v7240_v61 = vld [vmem:[%s7548_s17 + $0x328] sm:$0xff]  }
 0x6eb   : > { %v4278_v53 = vpop.f32.mrf.mxu0  ;;  %v4319_v58 = vpop.f32.mrf.mxu1  ;;  %6567 = vmatprep.subr.bf16.mxu0 %v7186_v2  ;;  %6589 = vmatprep.subr.bf16.mxu1 %v7187_v41  ;;  %v7217_v2 = vld [vmem:[%s7548_s17 + $0x298] sm:$0xff]   ;;  %v7218_v41 = vld [vmem:[%s7548_s17 + $0x250] sm:$0xff]  }
 0x6ec   : > { %v7222_v53 = vld [vmem:[%s7548_s17 + $0x248] sm:$0xff]   ;;  %v3794_v58 = vrot.slane %v8099_v24, %v3761_v28 }
 0x6ed   : > { %v4279_v63 = vpop.f32.mrf.mxu0  ;;  %v4320_v0 = vpop.f32.mrf.mxu1  ;;  %v7225_v28 = vld [vmem:[%s7548_s17 + $0x288] sm:$0xff]  }
 0x6ee   : > { %6568 = vmatpush3.bf16.msra.mxu0 %v7188_v52  ;;  %6590 = vmatpush3.bf16.msra.mxu1 %v7189_v54  ;;  %v7219_v52 = vld [vmem:[%s7548_s17 + $0x2d0] sm:$0xff]   ;;  %v7226_v63 = vld [vmem:[%s7548_s17 + $0x240] sm:$0xff]   ;;  %v4234_v0 = vadd.f32 %v8149_v21, %v3794_v58  ;;  %v7231_v21 = vld [vmem:[%s7548_s17 + $0x3f8] sm:$0xff]  }
 0x6ef   : > { %6569 = vmatprep.subr.bf16.mxu0 %v7190_v25  ;;  %6591 = vmatprep.subr.bf16.mxu1 %v7191_v51  ;;  %v7220_v54 = vld [vmem:[%s7548_s17 + $0x210] sm:$0xff]   ;;  %v7223_v25 = vld [vmem:[%s7548_s17 + $0x2c8] sm:$0xff]   ;;  %v3806_v51 = vrot.slane %v8099_v24, %v3773_v42  ;;  %v4318_v24 = vadd.f32 %v8170_v47, %v3814_v26  ;;  %v7228_v42 = vld [vmem:[%s7548_s17 + $0x200] sm:$0xff]  }
 0x6f0   : > { %v4332_v1 = vmax.f32 %v4234_v0, 0.0  ;;  %v7233_v47 = vld [vmem:[%s7548_s17 + $0x3b8] sm:$0xff]  }
 0x6f1   : > { %v4277_v22 = vadd.f32 %v8168_v50, %v3806_v51  ;;  %v7232_v50 = vld [vmem:[%s7548_s17 + $0x338] sm:$0xff]  }
 0x6f2   : > { %6570 = vmatpush3.bf16.msra.mxu0 %v7192_v23  ;;  %6592 = vmatpush3.bf16.msra.mxu1 %v7193_v29  ;;  %v7227_v23 = vld [vmem:[%s7548_s17 + $0x2c0] sm:$0xff]   ;;  %v7230_v29 = vld [vmem:[%s7548_s17 + $0x378] sm:$0xff]   ;;  %v4348_v7 = vpack.c.bf16 %v4332_v1, %v4332_v1 }
 0x6f3   : > { %6571 = vmatprep.subr.bf16.mxu0 %v7194_v30  ;;  %6593 = vmatprep.subr.bf16.mxu1 %v7195_v4  ;;  %v4335_v3 = vmax.f32 %v4277_v22, 0.0  ;;  %v4337_v30 = vmax.f32 %v4318_v24, 0.0  ;;  %v4346_v4 = vpack.c.bf16 %v4330_v43, %v4330_v43 }
 0x6f5   : > { %v4353_v11 = vpack.c.bf16 %v4337_v30, %v4337_v30 }
 0x6f6   : > { %6572 = vmatpush3.bf16.msra.mxu0 %v7196_v8  ;;  %6594 = vmatpush3.bf16.msra.mxu1 %v7197_v60  ;;  %v4351_v8 = vpack.c.bf16 %v4335_v3, %v4335_v3  ;;  %v7235_v60 = vld [vmem:[%s7548_s17 + $0x3f0] sm:$0xff]  }
 0x6f7   : > { %6601 = vmatprep.subr.bf16.mxu0 %v7198_v57  ;;  %6623 = vmatprep.subr.bf16.mxu1 %v7199_v48  ;;  %v7237_v57 = vld [vmem:[%s7548_s17 + $0x3b0] sm:$0xff]   ;;  %v7238_v48 = vld [vmem:[%s7548_s17 + $0x368] sm:$0xff]  }
 0x6f9   : > { %5498 = vmatmul.mubr.bf16.vlgmr.msra.gmra.mxu0 %v4342_v17  ;;  %5538 = vmatmul.mubr.bf16.vlgmr.msra.gmra.mxu1 %v4344_v18  ;;  %v7242_v17 = vld [vmem:[%s7548_s17 + $0x360] sm:$0xff]  }
 0x6fa   : > { %6602 = vmatpush3.bf16.msra.mxu0 %v7200_v16  ;;  %5577 = vmatprep.mubr.bf16.mxu0 %v4347_v32  ;;  %v7241_v16 = vld [vmem:[%s7548_s17 + $0x3a8] sm:$0xff]   ;;  %v7243_v18 = vld [vmem:[%s7548_s17 + $0x3e0] sm:$0xff]  }
 0x6fb   : > { %6624 = vmatpush3.bf16.msra.mxu1 %v7201_v31  ;;  %5617 = vmatprep.mubr.bf16.mxu1 %v4349_v36  ;;  %v7244_v31 = vld [vmem:[%s7548_s17 + $0x320] sm:$0xff]   ;;  %v7248_v36 = vld [vmem:[%s7548_s17 + $0x318] sm:$0xff]  }
 0x6fc   : > { %6603 = vmatprep.subr.bf16.mxu0 %v7202_v33  ;;  %6625 = vmatprep.subr.bf16.mxu1 %v7203_v35  ;;  %v7245_v32 = vld [vmem:[%s7548_s17 + $0x3a0] sm:$0xff]   ;;  %v7246_v33 = vld [vmem:[%s7548_s17 + $0x358] sm:$0xff]  }
 0x6fd   : > { %v7247_v35 = vld [vmem:[%s7548_s17 + $0x3d8] sm:$0xff]  }
 0x6fe   : > { %6604 = vmatpush3.bf16.msra.mxu0 %v7204_v37  ;;  %v7249_v37 = vld [vmem:[%s7548_s17 + $0x398] sm:$0xff]  }
 0x6ff   : > { %6626 = vmatpush3.bf16.msra.mxu1 %v7205_v6  ;;  %6605 = vmatprep.subr.bf16.mxu0 %v7206_v10  ;;  %v7250_v6 = vld [vmem:[%s7548_s17 + $0x350] sm:$0xff]  }
 0x700   : > { %6627 = vmatprep.subr.bf16.mxu1 %v7207_v38  ;;  %v7251_v10 = vld [vmem:[%s7548_s17 + $0x3d0] sm:$0xff]  }
 0x701   : > { %v7252_v38 = vld [vmem:[%s7548_s17 + $0x310] sm:$0xff]  }
 0x702   : > { %6606 = vmatpush3.bf16.msra.mxu0 %v7208_v19  ;;  %v7253_v19 = vld [vmem:[%s7548_s17 + $0x390] sm:$0xff]  }
 0x703   : > { %6628 = vmatpush3.bf16.msra.mxu1 %v7209_v39  ;;  %6607 = vmatprep.subr.bf16.mxu0 %v7210_v40  ;;  %v7254_v39 = vld [vmem:[%s7548_s17 + $0x348] sm:$0xff]  }
 0x704   : > { %6629 = vmatprep.subr.bf16.mxu1 %v7211_v27  ;;  %v7255_v40 = vld [vmem:[%s7548_s17 + $0x3c8] sm:$0xff]  }
 0x705   : > { %v7256_v27 = vld [vmem:[%s7548_s17 + $0x308] sm:$0xff]  }
 0x706   : > { %6608 = vmatpush3.bf16.msra.mxu0 %v7212_v44  ;;  %v7257_v44 = vld [vmem:[%s7548_s17 + $0x388] sm:$0xff]  }
 0x707   : > { %6630 = vmatpush3.bf16.msra.mxu1 %v7213_v45  ;;  %6609 = vmatprep.subr.bf16.mxu0 %v7214_v46  ;;  %v7258_v45 = vld [vmem:[%s7548_s17 + $0x340] sm:$0xff]  }
 0x708   : > { %6631 = vmatprep.subr.bf16.mxu1 %v7215_v34  ;;  %v7259_v46 = vld [vmem:[%s7548_s17 + $0x3c0] sm:$0xff]  }
 0x709   : > { %v7260_v34 = vld [vmem:[%s7548_s17 + $0x300] sm:$0xff]  }
 0x70a   : > { %6610 = vmatpush3.bf16.msra.mxu0 %v7216_v13  ;;  %v4334_v13 = vmax.f32 %v8163_v14, 0.0 }
 0x70b   : > { %6632 = vmatpush3.bf16.msra.mxu1 %v7217_v2  ;;  %6611 = vmatprep.subr.bf16.mxu0 %v7218_v41  ;;  %v7261_v2 = vld [vmem:[%s7548_s17 + $0x380] sm:$0xff]   ;;  %v4336_v41 = vmax.f32 %v8166_v49, 0.0 }
 0x70c   : > { %6633 = vmatprep.subr.bf16.mxu1 %v7219_v52  ;;  %v4350_v52 = vpack.c.bf16 %v4334_v13, %v4334_v13 }
 0x70e   : > { %6612 = vmatpush3.bf16.msra.mxu0 %v7220_v54  ;;  %v4352_v54 = vpack.c.bf16 %v4336_v41, %v4336_v41 }
 0x70f   : > { %6634 = vmatpush3.bf16.msra.mxu1 %v7221_v56  ;;  %6613 = vmatprep.subr.bf16.mxu0 %v7222_v53  ;;  %v6251_v53 = vld [vmem:[%s871_s29] ss:$0 sm:$0xff] }
 0x710   : > { %6635 = vmatprep.subr.bf16.mxu1 %v7223_v25 }
 0x712   : > { %6614 = vmatpush3.bf16.msra.mxu0 %v7224_v59 }
 0x713   : > { %6636 = vmatpush3.bf16.msra.mxu1 %v7225_v28  ;;  %6615 = vmatprep.subr.bf16.mxu0 %v7226_v63 }
 0x714   : > { %6637 = vmatprep.subr.bf16.mxu1 %v7227_v23 }
 0x716   : > { %6616 = vmatpush3.bf16.msra.mxu0 %v7228_v42 }
 0x717   : > { %6638 = vmatpush3.bf16.msra.mxu1 %v7229_v20  ;;  %6645 = vmatprep.subr.bf16.mxu0 %v7230_v29 }
 0x718   : > { %6667 = vmatprep.subr.bf16.mxu1 %v7231_v21 }
 0x719   : > { %5578 = vmatmul.mubr.bf16.vlgmr.msra.gmra.mxu0 %v4346_v4 }
 0x71a   : > { %5618 = vmatmul.mubr.bf16.vlgmr.msra.gmra.mxu1 %v4348_v7  ;;  %6646 = vmatpush3.bf16.msra.mxu0 %v7232_v50 }
 0x71b   : > { %5657 = vmatprep.mubr.bf16.mxu0 %v4351_v8  ;;  %6668 = vmatpush3.bf16.msra.mxu1 %v7233_v47 }
 0x71c   : > { %5697 = vmatprep.mubr.bf16.mxu1 %v4353_v11  ;;  %6647 = vmatprep.subr.bf16.mxu0 %v7234_v5 }
 0x71d   : > { %6669 = vmatprep.subr.bf16.mxu1 %v7235_v60 }
 0x71e   : > { %6648 = vmatpush3.bf16.msra.mxu0 %v7236_v12 }
 0x71f   : > { %6670 = vmatpush3.bf16.msra.mxu1 %v7237_v57  ;;  %6649 = vmatprep.subr.bf16.mxu0 %v7238_v48 }
 0x720   : > { %6671 = vmatprep.subr.bf16.mxu1 %v7239_v15 }
 0x722   : > { %6650 = vmatpush3.bf16.msra.mxu0 %v7240_v61 }
 0x723   : > { %6672 = vmatpush3.bf16.msra.mxu1 %v7241_v16  ;;  %6651 = vmatprep.subr.bf16.mxu0 %v7242_v17 }
 0x724   : > { %6673 = vmatprep.subr.bf16.mxu1 %v7243_v18 }
 0x726   : > { %6652 = vmatpush3.bf16.msra.mxu0 %v7244_v31 }
 0x727   : > { %6674 = vmatpush3.bf16.msra.mxu1 %v7245_v32  ;;  %6653 = vmatprep.subr.bf16.mxu0 %v7246_v33 }
 0x728   : > { %6675 = vmatprep.subr.bf16.mxu1 %v7247_v35 }
 0x72a   : > { %6654 = vmatpush3.bf16.msra.mxu0 %v7248_v36 }
 0x72b   : > { %6676 = vmatpush3.bf16.msra.mxu1 %v7249_v37  ;;  %6655 = vmatprep.subr.bf16.mxu0 %v7250_v6 }
 0x72c   : > { %6677 = vmatprep.subr.bf16.mxu1 %v7251_v10 }
 0x72e   : > { %6656 = vmatpush3.bf16.msra.mxu0 %v7252_v38 }
 0x72f   : > { %6678 = vmatpush3.bf16.msra.mxu1 %v7253_v19  ;;  %6657 = vmatprep.subr.bf16.mxu0 %v7254_v39 }
 0x730   : > { %6679 = vmatprep.subr.bf16.mxu1 %v7255_v40 }
 0x732   : > { %6658 = vmatpush3.bf16.msra.mxu0 %v7256_v27 }
 0x733   : > { %6680 = vmatpush3.bf16.msra.mxu1 %v7257_v44  ;;  %6659 = vmatprep.subr.bf16.mxu0 %v7258_v45 }
 0x734   : > { %6681 = vmatprep.subr.bf16.mxu1 %v7259_v46 }
 0x736   : > { %6660 = vmatpush3.bf16.msra.mxu0 %v7260_v34 }
 0x737   : > { %6682 = vmatpush3.bf16.msra.mxu1 %v7261_v2 }
 0x739   : > { %5658 = vmatmul.mubr.bf16.vlgmr.msra.gmra.mxu0 %v4350_v52  ;;  %v6381_v52 = vld [vmem:[%s877_s0] ss:$0 sm:$0xff] }
 0x73a   : > { %5698 = vmatmul.mubr.bf16.vlgmr.msra.gmra.mxu1 %v4352_v54 }
 0x799   : > { %v6529_v55 = vpop.f32.mrf.mxu0  ;;  %v6551_v56 = vpop.f32.mrf.mxu1 }
 0x79b   : > { %v6530_v14 = vpop.f32.mrf.mxu0  ;;  %v6552_v58 = vpop.f32.mrf.mxu1 }
 0x79c   : > { %v6531_v25 = vadd.f32 %v6530_v14, %v6529_v55  ;;  %v6553_v51 = vadd.f32 %v6552_v58, %v6551_v56 }
 0x79d   : > { %v6532_v26 = vpop.f32.mrf.mxu0  ;;  %v6554_v49 = vpop.f32.mrf.mxu1 }
 0x79e   : > { %v5420_v59 = vadd.f32 %v6531_v25, %v6251_v53 }
 0x79f   : > { %v6533_v62 = vpop.f32.mrf.mxu0  ;;  %v6555_v28 = vpop.f32.mrf.mxu1 }
 0x7a0   : > { %v5460_v63 = vadd.f32 %v6553_v51, %v5420_v59 }
 0x7b9   : > { %v6573_v0 = vpop.f32.mrf.mxu0  ;;  %v6595_v23 = vpop.f32.mrf.mxu1 }
 0x7bb   : > { %v6574_v22 = vpop.f32.mrf.mxu0  ;;  %v6596_v24 = vpop.f32.mrf.mxu1 }
 0x7bc   : > { %v6575_v5 = vadd.f32 %v6574_v22, %v6573_v0  ;;  %v6597_v60 = vadd.f32 %v6596_v24, %v6595_v23 }
 0x7bd   : > { %v6576_v42 = vpop.f32.mrf.mxu0  ;;  %v6598_v43 = vpop.f32.mrf.mxu1 }
 0x7be   : > { %v5500_v8 = vadd.f32 %v6575_v5, %v5460_v63 }
 0x7bf   : > { %v6577_v20 = vpop.f32.mrf.mxu0  ;;  %v6599_v29 = vpop.f32.mrf.mxu1 }
 0x7c0   : > { %v5540_v12 = vadd.f32 %v6597_v60, %v5500_v8 }
 0x7d9   : > { %v6617_v1 = vpop.f32.mrf.mxu0 }
 0x7da   : > { %v6639_v21 = vpop.f32.mrf.mxu1 }
 0x7db   : > { %v6618_v3 = vpop.f32.mrf.mxu0 }
 0x7dc   : > { %v6640_v30 = vpop.f32.mrf.mxu1  ;;  %v6619_v11 = vadd.f32 %v6618_v3, %v6617_v1 }
 0x7dd   : > { %v6620_v50 = vpop.f32.mrf.mxu0  ;;  %v6641_v15 = vadd.f32 %v6640_v30, %v6639_v21 }
 0x7de   : > { %v6642_v4 = vpop.f32.mrf.mxu1  ;;  %v5580_v57 = vadd.f32 %v6619_v11, %v5540_v12 }
 0x7df   : > { %v6621_v47 = vpop.f32.mrf.mxu0 }
 0x7e0   : > { %v6643_v7 = vpop.f32.mrf.mxu1  ;;  %v5620_v17 = vadd.f32 %v6641_v15, %v5580_v57 }
 0x7f9   : > { %v6661_v48 = vpop.f32.mrf.mxu0 }
 0x7fa   : > { %v6683_v61 = vpop.f32.mrf.mxu1 }
 0x7fb   : > { %v6662_v16 = vpop.f32.mrf.mxu0 }
 0x7fc   : > { %v6663_v18 = vadd.f32 %v6662_v16, %v6661_v48  ;;  %v6684_v31 = vpop.f32.mrf.mxu1 }
 0x7fd   : > { %v6664_v32 = vpop.f32.mrf.mxu0  ;;  %v6685_v35 = vadd.f32 %v6684_v31, %v6683_v61 }
 0x7fe   : > { %v5660_v33 = vadd.f32 %v6663_v18, %v5620_v17  ;;  %v6686_v36 = vpop.f32.mrf.mxu1 }
 0x7ff   : > { %v6665_v37 = vpop.f32.mrf.mxu0 }
 0x800   : > { %v5700_v6 = vadd.f32 %v6685_v35, %v5660_v33  ;;  %v6687_v10 = vpop.f32.mrf.mxu1 }
 0x802   : > { %v5705_v38 = vadd.f32 %v5700_v6, %v8017_v9  ;;  %v6380_v9 = vld [vmem:[%s874_s6] ss:$0 sm:$0xff] }
 0x804   : > { %v5708_v19 = vsel %vm992_vm2, %v5705_v38, 0.0 }
 0x805   : > { %5709 = vadd.xlane.f32.xlu0 %v5708_v19 }
 0x88e   : > { %v5710_v39 = vpop.xlane.xlu0 %5709 }
 0x88f   : > { %v5711_v40 = vmul.f32 0.03125, %v5710_v39 }
 0x891   : > { %v5712_v27 = vsub.f32 %v5705_v38, %v5711_v40 }
 0x893   : > { %v5713_v44 = vmul.f32 %v5712_v27, %v5712_v27 }
 0x895   : > { %v5714_v45 = vsel %vm992_vm2, %v5713_v44, 0.0 }
 0x896   : > { %5715 = vadd.xlane.f32.xlu1 %v5714_v45 }
 0x91f   : > { %v5716_v46 = vpop.xlane.xlu1 %5715 }
 0x920   : > { %v5717_v34 = vmul.f32 0.03125, %v5716_v46 }
 0x922   : > { %v5718_v13 = vadd.f32 1e-05, %v5717_v34 }
 0x924   : > { %7296 = vrsqrt.f32 %v5718_v13 }
 0x931   : > { %v7297_v2 = vpop.eup %7296 }
 0x932   : > { %v5720_v41 = vmul.f32 %v7297_v2, %v5712_v27 }
 0x934   : > { %v5727_v54 = vmul.f32 %v6380_v9, %v5720_v41  ;;  %5739 = sbr.rel (%p6382_p8) target bundleno = 2566 (0xa06), region = 104 }
 0x936   : > { %v5734_v55 = vadd.f32 %v6381_v52, %v5727_v54 }
 0x938   : > { %5735 = vst.msk [vmem:[#allocation2] sm:$0xff] %vm992_vm2, %v5734_v55 }
 0x939   : > { %v5743_v56 = vld [vmem:[%s8406_s24 + $0x18] sm:$0xff]  ;;  %v7342_v53 = vmov 0.0   ;;  %v5742_v14 = vld [vmem:[%s8406_s24 + $0x10] sm:$0xff]  ;;  %vm7343_vm7 = vmmov 0   ;;  %v5741_v58 = vld [vmem:[%s8406_s24 + $0x8] sm:$0xff]  ;;  %vm5824_vm8 = vcmask 130048  }
 0x93a   : > { %7030 = vmatprep.subr.mxu0 %v7342_v53  ;;  %7038 = vmatprep.mubr.msk.f32.mxu0 %vm7343_vm7, %v7342_v53  ;;  %v5740_v25 = vld [vmem:[%s8406_s24] sm:$0xff] }
 0x93b   : > { %7031 = vmatpush3.msra.mxu0 %v5743_v56  ;;  %v6383_v51 = vld [vmem:[%s8407_s3] ss:$0 sm:$0xff] }
 0x93c   : > { %7032 = vmatprep.subr.mxu0 %v7342_v53 }
 0x93d   : > { %7033 = vmatpush3.msra.mxu0 %v5742_v14 }
 0x93e   : > { %7034 = vmatprep.subr.mxu0 %v7342_v53 }
 0x93f   : > { %7035 = vmatpush3.msra.mxu0 %v5741_v58 }
 0x940   : > { %7036 = vmatprep.subr.mxu0 %v7342_v53 }
 0x941   : > { %7037 = vmatpush3.msra.mxu0 %v5740_v25 }
 0x942   : > { %7039 = vmatmul.mubr.msk.f32.vlgmr.msra.gmra.mxu0 %vm992_vm2, %v5734_v55 }
 0xa02   : > { %v5820_v26 = vpop.f32.mrf.mxu0 }
 0xa03   : > { %v5821_v49 = vadd.f32 %v6383_v51, %v5820_v26 }
 0xa04   : > { %v7040_v59 = vpop.f32.mrf.mxu0 }
 0xa05   : > { %5825 = vst.msk [vmem:[%s7565_s19] sm:$0xff] %vm5824_vm8, %v5821_v49 }
 0xa06 PF: > { %s8408_s26 = sld [smem:[#allocation6_spill]] }
 0xa07   : > { %s8409_s0 = sld [smem:[#allocation4_spill]] }
 0xa08   : > { %s8410_s30 = sld [smem:[#allocation5_spill]] }
 0xa09   : > { %s8411_s20 = sld [smem:[#allocation7_spill]] }
 0xa0a   : > { %s8412_s21 = sld [smem:[#allocation8_spill]] }
 0xa0c   : > { %s29_s1 = sadd.s32 1, %s8408_s26  }
 0xa0d   : > { %p26_p9 = scmp.ge.s32.totalorder %s29_s1, 6  }
 0xa0f   :  { %28 = sbr.rel (!%p26_p9) target bundleno = 15 (0xf), region = 182 }

</bundles_post_ra>
